<compile_context>
chip_gen: v7x
topology: tpu7x:2x2x1
jax: 0.10.0
libtpu: 0.0.40
codegen_flags: <defaults>
</compile_context>

<pallas_src>
import math

import jax
import jax.numpy as jnp
import numpy as np
from jax.experimental import pallas as pl
from jax.experimental.pallas import tpu as pltpu

NEG_INF = -1e10          # config.neg_inf default
_MIB = 1024 * 1024


# ----------------------------- small math helpers ----------------------------
def _erf(x):
    # Abramowitz & Stegun 7.1.26 polynomial approximation of erf (Horner/FMA).
    a1, a2, a3, a4, a5 = 0.254829592, -0.284496736, 1.421413741, -1.453152027, 1.061405429
    p = 0.3275911
    sgn = jnp.where(x < 0.0, -1.0, 1.0)
    ax = jnp.abs(x)
    t = 1.0 / (1.0 + p * ax)
    poly = ((((a5 * t + a4) * t + a3) * t + a2) * t + a1) * t
    return sgn * (1.0 - poly * jnp.exp(-ax * ax))   # exp -> EUP slot


def _gelu_exact(x):
    return 0.5 * x * (1.0 + _erf(x * (1.0 / math.sqrt(2.0))))


def _layer_norm(x, gamma, beta, eps):
    mean = jnp.mean(x, axis=-1, keepdims=True)
    var = jnp.mean((x - mean) ** 2, axis=-1, keepdims=True)
    return (x - mean) * jax.lax.rsqrt(var + eps) * gamma + beta


def _pick_tile(total, preferred, aligns=(256, 128, 8)):
    """Largest t <= preferred with total % t == 0 and t % align == 0 for the
    largest feasible align; falls back to the full dimension."""
    if total <= preferred:
        return total
    for align in aligns:
        t = (preferred // align) * align
        while t >= align:
            if total % t == 0:
                return t
            t -= align
    return total


def _tpu_vmem_bytes():
    """Physical VMEM per TensorCore (generation-aware tiling); safe fallback."""
    try:
        info = pltpu.get_tpu_info()
        for name in ("vmem_capacity_bytes", "vmem_bytes", "vmem_size_bytes"):
            v = getattr(info, name, None)
            if v:
                return int(v)
    except Exception:
        pass
    return 128 * _MIB


def _const_spec(shape, single_buffer):
    """BlockSpec for a grid-invariant input; optionally single-buffered to save
    VMEM on small-VMEM parts (v7x)."""
    index_map = lambda *_: (0,) * len(shape)
    if single_buffer:
        try:
            return pl.BlockSpec(shape, index_map, pipeline_mode=pl.Buffered(1))
        except (TypeError, AttributeError):
            pass   # older runtime without pipeline_mode / Buffered support
    return pl.BlockSpec(shape, index_map)


def _call_with_fallback(build, args, single_buffer):
    """Run the pallas_call; if the single-buffer-consts variant is rejected at
    compile/run time, transparently retry with default double buffering."""
    if single_buffer:
        try:
            return build(True)(*args)
        except Exception:
            pass
    return build(False)(*args)


# ------------------------ kernel A: attention + LN1 --------------------------
def make_attention_kernel(num_heads, head_size, eps):
    scale = 1.0 / math.sqrt(head_size)

    def kernel(mask_ref, x_ref,
               wq_ref, bq_ref, wk_ref, bk_ref, wo3_ref, bo_ref,
               g1_ref, be1_ref,
               h1_ref, k_scr):
        qi = pl.program_id(1)
        cd = wq_ref.dtype                    # MXU operand dtype (bf16 or f32)
        s_len = x_ref.shape[1]
        tq = h1_ref.shape[1]

        # --- K(=V) projection hoisted: once per batch, stored head-major ------
        # (source module uses self.key(...) for the values too => V == K)
        @pl.when(qi == 0)
        def _project_kv():
            xf = x_ref[0]                                            # (S, H) f32
            k = jnp.dot(xf.astype(cd), wk_ref[...],
                        preferred_element_type=jnp.float32) + bk_ref[...]
            # one head-split relayout per batch, amortized over all q tiles
            k_scr[...] = (k.astype(cd)
                          .reshape(s_len, num_heads, head_size)
                          .swapaxes(0, 1))                           # (nh, S, dh)

        # --- query rows for this tile, sliced from the resident full-S block --
        row0 = pl.multiple_of(qi * tq, tq)
        xq = x_ref[0, pl.ds(row0, tq), :]                            # (tq, H) f32

        q = (jnp.dot(xq.astype(cd), wq_ref[...],
                     preferred_element_type=jnp.float32) + bq_ref[...]) * scale
        qh = q.astype(cd).reshape(tq, num_heads, head_size).swapaxes(0, 1)  # (nh,tq,dh)
        kh = k_scr[...]                                              # (nh, S, dh)

        mask_bias = mask_ref[0] * NEG_INF                            # (1, S)
        s = jnp.einsum('hqd,hkd->hqk', qh, kh,
                       preferred_element_type=jnp.float32)           # (nh, tq, S)
        s = s + mask_bias
        s = s - jnp.max(s, axis=-1, keepdims=True)                   # stable softmax
        ps = jnp.exp(s)
        ps = ps * pl.reciprocal(jnp.sum(ps, axis=-1, keepdims=True), approx=True)

        ctx = jnp.einsum('hqk,hkd->hqd', ps.astype(cd), kh,
                         preferred_element_type=jnp.float32)          # (nh, tq, dh)

        # output projection with the head axis folded into the weight (nh,dh,H):
        # batched matmul + sum over the leading head axis (cheap VPU adds)
        # replaces the (nh,tq,dh)->(tq,H) relayout of v2.
        attn = jnp.einsum('hqd,hdo->hqo', ctx.astype(cd), wo3_ref[...],
                          preferred_element_type=jnp.float32).sum(axis=0)
        attn = attn + bo_ref[...]                                     # (tq, H)

        h1 = _layer_norm(attn + xq, g1_ref[...], be1_ref[...], eps)
        h1_ref[0] = h1.astype(h1_ref.dtype)

    return kernel


def attention_forward(x, mask3, p, num_heads, eps, *, q_tile, compute_dtype,
                      vmem_limit_bytes, single_buffer_consts):
    B, S, H = x.shape
    head_size = H // num_heads
    tq = q_tile
    n_q = S // tq
    cd = compute_dtype

    kernel = make_attention_kernel(num_heads, head_size, eps)
    # per-head output-projection weight (nh, dh, H): free reshape in the wrapper
    wo3 = p["wo"].reshape(num_heads, head_size, H).astype(cd)

    def build(single_buf):
        def const(shape):
            return _const_spec(shape, single_buf)
        in_specs = [
            pl.BlockSpec((1, 1, S), lambda b, qi: (b, 0, 0)),    # mask   (B,1,S)
            pl.BlockSpec((1, S, H), lambda b, qi: (b, 0, 0)),    # x full seq/batch
            const((H, H)), const((1, H)),                        # wq, bq
            const((H, H)), const((1, H)),                        # wk, bk
            const((num_heads, head_size, H)), const((1, H)),     # wo3, bo
            const((1, H)), const((1, H)),                        # LN1 gamma, beta
        ]
        grid_spec = pltpu.PrefetchScalarGridSpec(
            num_scalar_prefetch=0,
            grid=(B, n_q),
            in_specs=in_specs,
            out_specs=pl.BlockSpec((1, tq, H), lambda b, qi: (b, qi, 0)),
            # head-major K(=V) scratch, compute dtype, carried across q tiles
            scratch_shapes=[pltpu.VMEM((num_heads, S, head_size), cd)],
        )
        return pl.pallas_call(
            kernel,
            out_shape=jax.ShapeDtypeStruct((B, S, H), jnp.float32),
            grid_spec=grid_spec,
            compiler_params=pltpu.CompilerParams(
                # qi must be "arbitrary": the per-batch K scratch carries across it;
                # B stays "parallel" for megacore (v7x) sharding.
                dimension_semantics=("parallel", "arbitrary"),
                vmem_limit_bytes=vmem_limit_bytes),
        )

    args = (mask3, x,
            p["wq"].astype(cd), p["bq"], p["wk"].astype(cd), p["bk"],
            wo3, p["bo"], p["g1"], p["be1"])
    return _call_with_fallback(build, args, single_buffer_consts)


# --------------------------- kernel B: FFN + LN2 ------------------------------
def make_ffn_kernel(eps):
    def kernel(h1_ref, wi_ref, bi_ref, w2_ref, b2_ref, g2_ref, be2_ref,
               out_ref, h1c_scr, acc_scr):
        ii = pl.program_id(1)
        cd = wi_ref.dtype

        @pl.when(ii == 0)
        def _init():
            h1c_scr[...] = h1_ref[...].astype(cd)    # cast once per row tile
            acc_scr[...] = jnp.zeros_like(acc_scr)

        inter = jnp.dot(h1c_scr[...], wi_ref[...],
                        preferred_element_type=jnp.float32) + bi_ref[...]
        inter = _gelu_exact(inter)
        acc_scr[...] += jnp.dot(inter.astype(cd), w2_ref[...],
                                preferred_element_type=jnp.float32)

        @pl.when(ii == pl.num_programs(1) - 1)
        def _finalize():
            out = acc_scr[...] + b2_ref[...]
            out_ref[...] = _layer_norm(out + h1_ref[...], g2_ref[...], be2_ref[...],
                                       eps).astype(out_ref.dtype)

    return kernel


def ffn_forward(h1_flat, p, eps, *, r_tile, i_tile, compute_dtype,
                vmem_limit_bytes, single_buffer_consts):
    R, H = h1_flat.shape
    I = p["wi"].shape[1]
    tr, ti = r_tile, i_tile
    n_r, n_i = R // tr, I // ti
    cd = compute_dtype
    kernel = make_ffn_kernel(eps)

    def build(single_buf):
        def const(shape):
            return _const_spec(shape, single_buf)
        in_specs = [
            pl.BlockSpec((tr, H), lambda ri, ii: (ri, 0)),       # h1 row tile
            pl.BlockSpec((H, ti), lambda ri, ii: (0, ii)),       # wi tile
            pl.BlockSpec((1, ti), lambda ri, ii: (0, ii)),       # bi tile
            pl.BlockSpec((ti, H), lambda ri, ii: (ii, 0)),       # w2 tile
            const((1, H)), const((1, H)), const((1, H)),         # b2, LN2 gamma/beta
        ]
        grid_spec = pltpu.PrefetchScalarGridSpec(
            num_scalar_prefetch=0,
            grid=(n_r, n_i),
            in_specs=in_specs,
            out_specs=pl.BlockSpec((tr, H), lambda ri, ii: (ri, 0)),
            scratch_shapes=[pltpu.VMEM((tr, H), cd),             # h1 in compute dtype
                            pltpu.VMEM((tr, H), jnp.float32)],   # FFN accumulator
        )
        return pl.pallas_call(
            kernel,
            out_shape=jax.ShapeDtypeStruct((R, H), jnp.float32),
            grid_spec=grid_spec,
            compiler_params=pltpu.CompilerParams(
                dimension_semantics=("parallel", "arbitrary"),
                vmem_limit_bytes=vmem_limit_bytes),
        )

    args = (h1_flat, p["wi"].astype(cd), p["bi"], p["w2"].astype(cd),
            p["b2"], p["g2"], p["be2"])
    return _call_with_fallback(build, args, single_buffer_consts)


# ------------------------------ layer / encoder -------------------------------
def trans_layer_forward(x, mask3, p, num_heads, eps, *,
                        q_tile=None, r_tile=None, i_tile=None,
                        compute_dtype=jnp.bfloat16,
                        vmem_limit_bytes=None,
                        single_buffer_consts=None):
    B, S, H = x.shape
    I = p["wi"].shape[1]

    cap = _tpu_vmem_bytes()
    small_vmem = cap <= 96 * _MIB            # v7x-class part (64 MiB physical)
    if vmem_limit_bytes is None:
        vmem_limit_bytes = int(max(min(cap - 12 * _MIB, 100 * _MIB), 32 * _MIB))
    if single_buffer_consts is None:
        single_buffer_consts = small_vmem    # spend saved VMEM where it is scarce

    if q_tile is None:
        # cap the (nh, tq, S) f32 score tensor, then align for the MXU
        score_budget = (16 if small_vmem else 32) * _MIB
        tq_cap = max(8, score_budget // max(1, num_heads * S * 4))
        q_tile = _pick_tile(S, min(128 if small_vmem else 256, tq_cap))
    if i_tile is None:
        i_tile = _pick_tile(I, 256 if small_vmem else 512, aligns=(256, 128))
    if r_tile is None:
        r_tile = _pick_tile(B * S, 256 if small_vmem else 512)

    assert S % q_tile == 0 and (q_tile == S or q_tile % 8 == 0), (S, q_tile)
    assert I % i_tile == 0 and (i_tile == I or i_tile % 128 == 0), (I, i_tile)
    assert (B * S) % r_tile == 0 and (r_tile == B * S or r_tile % 8 == 0), (B * S, r_tile)

    h1 = attention_forward(x, mask3, p, num_heads, eps,
                           q_tile=q_tile, compute_dtype=compute_dtype,
                           vmem_limit_bytes=vmem_limit_bytes,
                           single_buffer_consts=single_buffer_consts)
    # FFN streams over flattened rows so one wi/w2 pass serves rows across
    # batches and q-tiles (the reshape just merges leading dims).
    out_flat = ffn_forward(h1.reshape(B * S, H), p, eps,
                           r_tile=r_tile, i_tile=i_tile,
                           compute_dtype=compute_dtype,
                           vmem_limit_bytes=vmem_limit_bytes,
                           single_buffer_consts=single_buffer_consts)
    return out_flat.reshape(B, S, H)


def trans_encoder_forward(hidden_states, attention_mask,
                          encoder_hidden_states=None, encoder_attention_mask=None,
                          *, params_list, num_heads, eps,
                          q_tile=None, r_tile=None, i_tile=None,
                          compute_dtype=jnp.bfloat16,
                          vmem_limit_bytes=None, single_buffer_consts=None):
    # is_decoder=False (config default) => encoder_hidden_states /
    # encoder_attention_mask unused, matching TransLayer.forward.
    del encoder_hidden_states, encoder_attention_mask
    B, S, _ = hidden_states.shape
    mask3 = attention_mask.astype(jnp.float32).reshape(B, 1, S)
    x = hidden_states
    for p in params_list:
        x = trans_layer_forward(x, mask3, p, num_heads, eps,
                                q_tile=q_tile, r_tile=r_tile, i_tile=i_tile,
                                compute_dtype=compute_dtype,
                                vmem_limit_bytes=vmem_limit_bytes,
                                single_buffer_consts=single_buffer_consts)
    return x


# ----------------------- deterministic parameter init ------------------------
def init_params(key, num_layers, H, I, init_range=0.02):
    layers = []
    f32 = jnp.float32
    for l in range(num_layers):
        ks = jax.random.split(jax.random.fold_in(key, l), 16)
        layers.append(dict(
            wq=init_range * jax.random.normal(ks[0], (H, H), f32),
            bq=init_range * jax.random.normal(ks[1], (1, H), f32),
            wk=init_range * jax.random.normal(ks[2], (H, H), f32),
            bk=init_range * jax.random.normal(ks[3], (1, H), f32),
            # (the module's `value` Linear exists but is unused in forward)
            wo=init_range * jax.random.normal(ks[4], (H, H), f32),
            bo=init_range * jax.random.normal(ks[5], (1, H), f32),
            g1=jnp.ones((1, H), f32) + 0.01 * jax.random.normal(ks[6], (1, H), f32),
            be1=0.01 * jax.random.normal(ks[7], (1, H), f32),
            wi=init_range * jax.random.normal(ks[8], (H, I), f32),
            bi=init_range * jax.random.normal(ks[9], (1, I), f32),
            w2=init_range * jax.random.normal(ks[10], (I, H), f32),
            b2=init_range * jax.random.normal(ks[11], (1, H), f32),
            g2=jnp.ones((1, H), f32) + 0.01 * jax.random.normal(ks[12], (1, H), f32),
            be2=0.01 * jax.random.normal(ks[13], (1, H), f32),
        ))
    return layers


# ------------------------------ pure-JAX reference ----------------------------
def reference_encoder(x, mask_bool, params_list, num_heads, eps):
    B, S, H = x.shape
    dh = H // num_heads
    for p in params_list:
        q = x @ p["wq"] + p["bq"]
        k = x @ p["wk"] + p["bk"]
        v = k  # same source bug (value projection never used)

        def split(t):
            return t.reshape(B, S, num_heads, dh).transpose(0, 2, 1, 3)

        qh, kh, vh = split(q), split(k), split(v)
        s = jnp.einsum("bhqd,bhkd->bhqk", qh, kh) / math.sqrt(dh)
        s = jnp.where(mask_bool[:, None, None, :], NEG_INF, s)
        probs = jax.nn.softmax(s, axis=-1)
        ctx = jnp.einsum("bhqk,bhkd->bhqd", probs, vh).transpose(0, 2, 1, 3).reshape(B, S, H)
        attn = ctx @ p["wo"] + p["bo"]
        h1 = _layer_norm(attn + x, p["g1"], p["be1"], eps)
        inter = _gelu_exact(h1 @ p["wi"] + p["bi"])
        out = inter @ p["w2"] + p["b2"]
        x = _layer_norm(out + h1, p["g2"], p["be2"], eps)
    return x


if __name__ == "__main__":
    # Small shapes chosen so every tiling axis is exercised:
    #   S=16, q_tile=8  -> 2 query tiles (K-scratch carry across qi),
    #   B*S=32, r_tile=16 -> 2 FFN row tiles,
    #   I=256, i_tile=128 -> 2 intermediate tiles (FFN accumulator).
    B, S, H, NH, I, L = 2, 16, 32, 4, 256, 2
    EPS = 1e-10  # config.layer_norm_eps default

    key = jax.random.PRNGKey(0)
    kx, kp = jax.random.split(key)
    x = jax.random.normal(kx, (B, S, H), jnp.float32)

    # attention_mask: (B, S) bool, True => ignore that key position
    lengths = jnp.array([S, 5])
    mask_bool = jnp.arange(S)[None, :] >= lengths[:, None]

    params_list = init_params(kp, L, H, I)
    y_ref = reference_encoder(x, mask_bool, params_list, NH, EPS)

    # Default path: bf16 MXU operands / f32 accumulation (loose tolerance).
    y_bf16 = trans_encoder_forward(x, mask_bool, None, None,
                                   params_list=params_list, num_heads=NH, eps=EPS,
                                   q_tile=8, r_tile=16, i_tile=128)
    y_bf16 = jax.block_until_ready(y_bf16)
    err_bf16 = float(np.max(np.abs(np.asarray(y_bf16) - np.asarray(y_ref))))
    assert err_bf16 < 1e-1, "bf16 path max abs diff = %e" % err_bf16

    # f32 MXU path (tight tolerance; slack only for the approx softmax reciprocal).
    y_f32 = trans_encoder_forward(x, mask_bool, None, None,
                                  params_list=params_list, num_heads=NH, eps=EPS,
                                  q_tile=8, r_tile=16, i_tile=128,
                                  compute_dtype=jnp.float32)
    y_f32 = jax.block_until_ready(y_f32)
    err_f32 = float(np.max(np.abs(np.asarray(y_f32) - np.asarray(y_ref))))
    assert err_f32 < 2e-3, "f32 path max abs diff = %e" % err_f32

    print("KERNEL_OK")
</pallas_src>

<mosaic_0001>
module attributes {stable_mosaic.version = 11 : i64} {
  func.func @kernel(%arg0: i32, %arg1: i32, %arg2: memref<1x1x16xf32, #tpu.memory_space<vmem>>, %arg3: memref<1x16x32xf32, #tpu.memory_space<vmem>>, %arg4: memref<32x32xbf16, #tpu.memory_space<vmem>>, %arg5: memref<1x32xf32, #tpu.memory_space<vmem>>, %arg6: memref<32x32xbf16, #tpu.memory_space<vmem>>, %arg7: memref<1x32xf32, #tpu.memory_space<vmem>>, %arg8: memref<4x8x32xbf16, #tpu.memory_space<vmem>>, %arg9: memref<1x32xf32, #tpu.memory_space<vmem>>, %arg10: memref<1x32xf32, #tpu.memory_space<vmem>>, %arg11: memref<1x32xf32, #tpu.memory_space<vmem>>, %arg12: memref<1x8x32xf32, #tpu.memory_space<vmem>>, %arg13: memref<4x16x8xbf16, #tpu.memory_space<vmem>>) attributes {dimension_semantics = [#tpu.dimension_semantics<parallel>, #tpu.dimension_semantics<arbitrary>], iteration_bounds = array<i64: 2, 2>, scalar_prefetch = 0 : i64, scratch_operands = 1 : i64, tpu.core_type = #tpu.core_type<tc>, window_params = [{transform_indices = @transform_0, window_bounds = array<i64: 1, 1, 16>}, {transform_indices = @transform_1, window_bounds = array<i64: 1, 16, 32>}, {pipeline_mode = #tpu.pipeline_mode<synchronous>, transform_indices = @transform_2, window_bounds = array<i64: 32, 32>}, {pipeline_mode = #tpu.pipeline_mode<synchronous>, transform_indices = @transform_3, window_bounds = array<i64: 1, 32>}, {pipeline_mode = #tpu.pipeline_mode<synchronous>, transform_indices = @transform_4, window_bounds = array<i64: 32, 32>}, {pipeline_mode = #tpu.pipeline_mode<synchronous>, transform_indices = @transform_5, window_bounds = array<i64: 1, 32>}, {pipeline_mode = #tpu.pipeline_mode<synchronous>, transform_indices = @transform_6, window_bounds = array<i64: 4, 8, 32>}, {pipeline_mode = #tpu.pipeline_mode<synchronous>, transform_indices = @transform_7, window_bounds = array<i64: 1, 32>}, {pipeline_mode = #tpu.pipeline_mode<synchronous>, transform_indices = @transform_8, window_bounds = array<i64: 1, 32>}, {pipeline_mode = #tpu.pipeline_mode<synchronous>, transform_indices = @transform_9, window_bounds = array<i64: 1, 32>}, {transform_indices = @transform_10, window_bounds = array<i64: 1, 8, 32>}]} {
    %c0_i32 = arith.constant 0 : i32
    %0 = arith.cmpi eq, %arg1, %c0_i32 : i32
    %1 = arith.extui %0 : i1 to i32
    %c0_i32_0 = arith.constant 0 : i32
    %2 = arith.cmpi ne, %1, %c0_i32_0 : i32
    scf.if %2 {
      %c0_37 = arith.constant 0 : index
      %c0_38 = arith.constant 0 : index
      %c0_39 = arith.constant 0 : index
      %75 = vector.load %arg3[%c0_37, %c0_38, %c0_39] : memref<1x16x32xf32, #tpu.memory_space<vmem>>, vector<1x16x32xf32>
      %76 = vector.shape_cast %75 : vector<1x16x32xf32> to vector<16x32xf32>
      %77 = arith.truncf %76 : vector<16x32xf32> to vector<16x32xbf16>
      %c0_40 = arith.constant 0 : index
      %c0_41 = arith.constant 0 : index
      %78 = vector.load %arg6[%c0_40, %c0_41] : memref<32x32xbf16, #tpu.memory_space<vmem>>, vector<32x32xbf16>
      %cst_42 = arith.constant dense<0.000000e+00> : vector<16x32xf32>
      %79 = tpu.matmul %77, %78, %cst_42 {dimension_numbers = #tpu.dot_dimension_numbers<[1], [0], [0], [1], [0, 0, 1, 1], [], []>} : vector<16x32xbf16>, vector<32x32xbf16>, vector<16x32xf32> -> vector<16x32xf32>
      %c0_43 = arith.constant 0 : index
      %c0_44 = arith.constant 0 : index
      %80 = vector.load %arg7[%c0_43, %c0_44] : memref<1x32xf32, #tpu.memory_space<vmem>>, vector<1x32xf32>
      %81 = vector.broadcast %80 : vector<1x32xf32> to vector<16x32xf32>
      %82 = arith.addf %79, %81 : vector<16x32xf32>
      %83 = arith.truncf %82 : vector<16x32xf32> to vector<16x32xbf16>
      %84 = vector.shape_cast %83 : vector<16x32xbf16> to vector<16x4x8xbf16>
      %85 = tpu.transpose %84, [1, 0, 2] : vector<16x4x8xbf16> -> vector<4x16x8xbf16>
      %c0_45 = arith.constant 0 : index
      %c0_46 = arith.constant 0 : index
      %c0_47 = arith.constant 0 : index
      %86 = vector.load %arg13[%c0_45, %c0_46, %c0_47] : memref<4x16x8xbf16, #tpu.memory_space<vmem>>, vector<4x16x8xbf16>
      tpu.vector_store %arg13[%c0_45, %c0_46, %c0_47], %85 {strides = array<i32>} : memref<4x16x8xbf16, #tpu.memory_space<vmem>>, vector<4x16x8xbf16>,
    } else {
    }
    %c8_i32 = arith.constant 8 : i32
    %3 = arith.muli %arg1, %c8_i32 : i32
    %4 = tpu.assume_multiple %3, 8 : i32
    %c0 = arith.constant 0 : index
    %5 = arith.index_cast %4 : i32 to index
    %c0_1 = arith.constant 0 : index
    %6 = vector.load %arg3[%c0, %5, %c0_1] : memref<1x16x32xf32, #tpu.memory_space<vmem>>, vector<1x8x32xf32>
    %7 = vector.shape_cast %6 : vector<1x8x32xf32> to vector<8x32xf32>
    %8 = arith.truncf %7 : vector<8x32xf32> to vector<8x32xbf16>
    %c0_2 = arith.constant 0 : index
    %c0_3 = arith.constant 0 : index
    %9 = vector.load %arg4[%c0_2, %c0_3] : memref<32x32xbf16, #tpu.memory_space<vmem>>, vector<32x32xbf16>
    %cst = arith.constant dense<0.000000e+00> : vector<8x32xf32>
    %10 = tpu.matmul %8, %9, %cst {dimension_numbers = #tpu.dot_dimension_numbers<[1], [0], [0], [1], [0, 0, 1, 1], [], []>} : vector<8x32xbf16>, vector<32x32xbf16>, vector<8x32xf32> -> vector<8x32xf32>
    %c0_4 = arith.constant 0 : index
    %c0_5 = arith.constant 0 : index
    %11 = vector.load %arg5[%c0_4, %c0_5] : memref<1x32xf32, #tpu.memory_space<vmem>>, vector<1x32xf32>
    %12 = vector.broadcast %11 : vector<1x32xf32> to vector<8x32xf32>
    %13 = arith.addf %10, %12 : vector<8x32xf32>
    %cst_6 = arith.constant 0.353553385 : f32
    %14 = vector.broadcast %cst_6 : f32 to vector<8x32xf32>
    %15 = arith.mulf %13, %14 : vector<8x32xf32>
    %16 = arith.truncf %15 : vector<8x32xf32> to vector<8x32xbf16>
    %17 = vector.shape_cast %16 : vector<8x32xbf16> to vector<8x4x8xbf16>
    %18 = tpu.transpose %17, [1, 0, 2] : vector<8x4x8xbf16> -> vector<4x8x8xbf16>
    %c0_7 = arith.constant 0 : index
    %c0_8 = arith.constant 0 : index
    %c0_9 = arith.constant 0 : index
    %19 = vector.load %arg13[%c0_7, %c0_8, %c0_9] : memref<4x16x8xbf16, #tpu.memory_space<vmem>>, vector<4x16x8xbf16>
    %c0_10 = arith.constant 0 : index
    %c0_11 = arith.constant 0 : index
    %c0_12 = arith.constant 0 : index
    %20 = vector.load %arg2[%c0_10, %c0_11, %c0_12] : memref<1x1x16xf32, #tpu.memory_space<vmem>>, vector<1x1x16xf32>
    %21 = vector.shape_cast %20 : vector<1x1x16xf32> to vector<1x16xf32>
    %cst_13 = arith.constant -1.000000e+10 : f32
    %22 = vector.broadcast %cst_13 : f32 to vector<1x16xf32>
    %23 = arith.mulf %21, %22 : vector<1x16xf32>
    "tpu.trace_start"() <{level = 10 : i32, message = "hqd,hkd->hqk"}> : () -> ()
    %cst_14 = arith.constant dense<0.000000e+00> : vector<4x8x16xf32>
    %24 = tpu.matmul %18, %19, %cst_14 {dimension_numbers = #tpu.dot_dimension_numbers<[2], [2], [1], [1], [0, 0, 0, 1, 1, 1], [0], [0]>} : vector<4x8x8xbf16>, vector<4x16x8xbf16>, vector<4x8x16xf32> -> vector<4x8x16xf32>
    "tpu.trace_stop"() : () -> ()
    %25 = vector.shape_cast %23 : vector<1x16xf32> to vector<1x1x16xf32>
    %26 = vector.broadcast %25 : vector<1x1x16xf32> to vector<4x8x16xf32>
    %27 = arith.addf %24, %26 : vector<4x8x16xf32>
    %cst_15 = arith.constant dense<0xFF800000> : vector<4x8xf32>
    %28 = vector.multi_reduction <maximumf>, %27, %cst_15 [2] : vector<4x8x16xf32> to vector<4x8xf32>
    %29 = vector.shape_cast %28 : vector<4x8xf32> to vector<4x8x1xf32>
    %30 = vector.broadcast %29 : vector<4x8x1xf32> to vector<4x8x16xf32>
    %31 = arith.subf %27, %30 : vector<4x8x16xf32>
    %32 = math.exp %31 : vector<4x8x16xf32>
    %cst_16 = arith.constant dense<0.000000e+00> : vector<4x8xf32>
    %33 = vector.multi_reduction <add>, %32, %cst_16 [2] : vector<4x8x16xf32> to vector<4x8xf32>
    %34 = vector.shape_cast %33 : vector<4x8xf32> to vector<4x8x1xf32>
    %35 = tpu.reciprocal %34 {approx = true} : vector<4x8x1xf32> -> vector<4x8x1xf32>
    %36 = vector.broadcast %35 : vector<4x8x1xf32> to vector<4x8x16xf32>
    %37 = arith.mulf %32, %36 : vector<4x8x16xf32>
    %38 = arith.truncf %37 : vector<4x8x16xf32> to vector<4x8x16xbf16>
    "tpu.trace_start"() <{level = 10 : i32, message = "hqk,hkd->hqd"}> : () -> ()
    %cst_17 = arith.constant dense<0.000000e+00> : vector<4x8x8xf32>
    %39 = tpu.matmul %38, %19, %cst_17 {dimension_numbers = #tpu.dot_dimension_numbers<[2], [1], [1], [2], [0, 0, 0, 1, 1, 2], [0], [0]>} : vector<4x8x16xbf16>, vector<4x16x8xbf16>, vector<4x8x8xf32> -> vector<4x8x8xf32>
    "tpu.trace_stop"() : () -> ()
    %40 = arith.truncf %39 : vector<4x8x8xf32> to vector<4x8x8xbf16>
    %c0_18 = arith.constant 0 : index
    %c0_19 = arith.constant 0 : index
    %c0_20 = arith.constant 0 : index
    %41 = vector.load %arg8[%c0_18, %c0_19, %c0_20] : memref<4x8x32xbf16, #tpu.memory_space<vmem>>, vector<4x8x32xbf16>
    "tpu.trace_start"() <{level = 10 : i32, message = "hqd,hdo->hqo"}> : () -> ()
    %cst_21 = arith.constant dense<0.000000e+00> : vector<4x8x32xf32>
    %42 = tpu.matmul %40, %41, %cst_21 {dimension_numbers = #tpu.dot_dimension_numbers<[2], [1], [1], [2], [0, 0, 0, 1, 1, 2], [0], [0]>} : vector<4x8x8xbf16>, vector<4x8x32xbf16>, vector<4x8x32xf32> -> vector<4x8x32xf32>
    "tpu.trace_stop"() : () -> ()
    %cst_22 = arith.constant dense<0.000000e+00> : vector<8x32xf32>
    %43 = vector.multi_reduction <add>, %42, %cst_22 [0] : vector<4x8x32xf32> to vector<8x32xf32>
    %c0_23 = arith.constant 0 : index
    %c0_24 = arith.constant 0 : index
    %44 = vector.load %arg9[%c0_23, %c0_24] : memref<1x32xf32, #tpu.memory_space<vmem>>, vector<1x32xf32>
    %45 = vector.broadcast %44 : vector<1x32xf32> to vector<8x32xf32>
    %46 = arith.addf %43, %45 : vector<8x32xf32>
    %47 = arith.addf %46, %7 : vector<8x32xf32>
    %c0_25 = arith.constant 0 : index
    %c0_26 = arith.constant 0 : index
    %48 = vector.load %arg10[%c0_25, %c0_26] : memref<1x32xf32, #tpu.memory_space<vmem>>, vector<1x32xf32>
    %c0_27 = arith.constant 0 : index
    %c0_28 = arith.constant 0 : index
    %49 = vector.load %arg11[%c0_27, %c0_28] : memref<1x32xf32, #tpu.memory_space<vmem>>, vector<1x32xf32>
    %cst_29 = arith.constant dense<0.000000e+00> : vector<8xf32>
    %50 = vector.multi_reduction <add>, %47, %cst_29 [1] : vector<8x32xf32> to vector<8xf32>
    %51 = vector.shape_cast %50 : vector<8xf32> to vector<8x1xf32>
    %cst_30 = arith.constant 3.200000e+01 : f32
    %52 = vector.broadcast %cst_30 : f32 to vector<8x1xf32>
    %53 = arith.divf %51, %52 : vector<8x1xf32>
    %54 = vector.broadcast %53 : vector<8x1xf32> to vector<8x32xf32>
    %55 = arith.subf %47, %54 : vector<8x32xf32>
    %56 = arith.mulf %55, %55 : vector<8x32xf32>
    %cst_31 = arith.constant dense<0.000000e+00> : vector<8xf32>
    %57 = vector.multi_reduction <add>, %56, %cst_31 [1] : vector<8x32xf32> to vector<8xf32>
    %58 = vector.shape_cast %57 : vector<8xf32> to vector<8x1xf32>
    %cst_32 = arith.constant 3.200000e+01 : f32
    %59 = vector.broadcast %cst_32 : f32 to vector<8x1xf32>
    %60 = arith.divf %58, %59 : vector<8x1xf32>
    %61 = vector.broadcast %53 : vector<8x1xf32> to vector<8x32xf32>
    %62 = arith.subf %47, %61 : vector<8x32xf32>
    %cst_33 = arith.constant 1.000000e-10 : f32
    %63 = vector.broadcast %cst_33 : f32 to vector<8x1xf32>
    %64 = arith.addf %60, %63 : vector<8x1xf32>
    %65 = math.rsqrt %64 : vector<8x1xf32>
    %66 = vector.broadcast %65 : vector<8x1xf32> to vector<8x32xf32>
    %67 = arith.mulf %62, %66 : vector<8x32xf32>
    %68 = vector.broadcast %48 : vector<1x32xf32> to vector<8x32xf32>
    %69 = arith.mulf %67, %68 : vector<8x32xf32>
    %70 = vector.broadcast %49 : vector<1x32xf32> to vector<8x32xf32>
    %71 = arith.addf %69, %70 : vector<8x32xf32>
    %c0_34 = arith.constant 0 : index
    %c0_35 = arith.constant 0 : index
    %c0_36 = arith.constant 0 : index
    %72 = vector.load %arg12[%c0_34, %c0_35, %c0_36] : memref<1x8x32xf32, #tpu.memory_space<vmem>>, vector<1x8x32xf32>
    %73 = vector.shape_cast %72 : vector<1x8x32xf32> to vector<8x32xf32>
    %74 = vector.shape_cast %71 : vector<8x32xf32> to vector<1x8x32xf32>
    tpu.vector_store %arg12[%c0_34, %c0_35, %c0_36], %74 {strides = array<i32>} : memref<1x8x32xf32, #tpu.memory_space<vmem>>, vector<1x8x32xf32>,
    return
  }
  func.func @transform_0(%arg0: i32, %arg1: i32) -> (i32, i32, i32) {
    %c0_i32 = arith.constant 0 : i32
    %c0_i32_0 = arith.constant 0 : i32
    %c0_i32_1 = arith.constant 0 : i32
    return %arg0, %c0_i32, %c0_i32_0 : i32, i32, i32
  }
  func.func @transform_1(%arg0: i32, %arg1: i32) -> (i32, i32, i32) {
    %c0_i32 = arith.constant 0 : i32
    %c0_i32_0 = arith.constant 0 : i32
    %c0_i32_1 = arith.constant 0 : i32
    return %arg0, %c0_i32, %c0_i32_0 : i32, i32, i32
  }
  func.func @transform_2(%arg0: i32, %arg1: i32) -> (i32, i32) {
    %c0_i32 = arith.constant 0 : i32
    %c0_i32_0 = arith.constant 0 : i32
    %c0_i32_1 = arith.constant 0 : i32
    return %c0_i32, %c0_i32_0 : i32, i32
  }
  func.func @transform_3(%arg0: i32, %arg1: i32) -> (i32, i32) {
    %c0_i32 = arith.constant 0 : i32
    %c0_i32_0 = arith.constant 0 : i32
    %c0_i32_1 = arith.constant 0 : i32
    return %c0_i32, %c0_i32_0 : i32, i32
  }
  func.func @transform_4(%arg0: i32, %arg1: i32) -> (i32, i32) {
    %c0_i32 = arith.constant 0 : i32
    %c0_i32_0 = arith.constant 0 : i32
    %c0_i32_1 = arith.constant 0 : i32
    return %c0_i32, %c0_i32_0 : i32, i32
  }
  func.func @transform_5(%arg0: i32, %arg1: i32) -> (i32, i32) {
    %c0_i32 = arith.constant 0 : i32
    %c0_i32_0 = arith.constant 0 : i32
    %c0_i32_1 = arith.constant 0 : i32
    return %c0_i32, %c0_i32_0 : i32, i32
  }
  func.func @transform_6(%arg0: i32, %arg1: i32) -> (i32, i32, i32) {
    %c0_i32 = arith.constant 0 : i32
    %c0_i32_0 = arith.constant 0 : i32
    %c0_i32_1 = arith.constant 0 : i32
    %c0_i32_2 = arith.constant 0 : i32
    return %c0_i32, %c0_i32_0, %c0_i32_1 : i32, i32, i32
  }
  func.func @transform_7(%arg0: i32, %arg1: i32) -> (i32, i32) {
    %c0_i32 = arith.constant 0 : i32
    %c0_i32_0 = arith.constant 0 : i32
    %c0_i32_1 = arith.constant 0 : i32
    return %c0_i32, %c0_i32_0 : i32, i32
  }
  func.func @transform_8(%arg0: i32, %arg1: i32) -> (i32, i32) {
    %c0_i32 = arith.constant 0 : i32
    %c0_i32_0 = arith.constant 0 : i32
    %c0_i32_1 = arith.constant 0 : i32
    return %c0_i32, %c0_i32_0 : i32, i32
  }
  func.func @transform_9(%arg0: i32, %arg1: i32) -> (i32, i32) {
    %c0_i32 = arith.constant 0 : i32
    %c0_i32_0 = arith.constant 0 : i32
    %c0_i32_1 = arith.constant 0 : i32
    return %c0_i32, %c0_i32_0 : i32, i32
  }
  func.func @transform_10(%arg0: i32, %arg1: i32) -> (i32, i32, i32) {
    %c0_i32 = arith.constant 0 : i32
    %c0_i32_0 = arith.constant 0 : i32
    return %arg0, %arg1, %c0_i32 : i32, i32, i32
  }
}

</mosaic_0001>

<bundles_post_ra>
// kernel: tpu_custom_call.1
= control target key start
LH: loop header
LB: loop body
LE: loop exit
PB: predicated region body
PF: predicated region fallthrough
CT: control target
= control target key end

     0   :  { %s3525_s0 = inlined_call_operand.hbm [shape: f32[2,1,16], index: 0, kind: input, shape index: {}]   ;;  %s3526_s1 = inlined_call_operand.hbm [shape: f32[2,16,32], index: 1, kind: input, shape index: {}]   ;;  %s3527_s2 = inlined_call_operand.hbm [shape: bf16[32,32], index: 2, kind: input, shape index: {}]   ;;  %s3528_s3 = inlined_call_operand.hbm [shape: f32[1,32], index: 3, kind: input, shape index: {}]   ;;  %s3529_s4 = inlined_call_operand.hbm [shape: bf16[32,32], index: 4, kind: input, shape index: {}]   ;;  %s3530_s5 = inlined_call_operand.hbm [shape: f32[1,32], index: 5, kind: input, shape index: {}]   ;;  %s3531_s6 = inlined_call_operand.hbm [shape: bf16[4,8,32], index: 6, kind: input, shape index: {}]   ;;  %s3532_s7 = inlined_call_operand.hbm [shape: f32[1,32], index: 7, kind: input, shape index: {}]   ;;  %s3533_s8 = inlined_call_operand.hbm [shape: f32[1,32], index: 8, kind: input, shape index: {}]   ;;  %s3534_s9 = inlined_call_operand.hbm [shape: f32[1,32], index: 9, kind: input, shape index: {}]   ;;  %s3535_s10 = inlined_call_operand.hbm [shape: f32[2,16,32], index: 10, kind: output, shape index: {}]  }
   0x1   :  { %3549 = sst [smem:[#allocation35_spill]] %s3525_s0 }
   0x2   :  { %3550 = sst [smem:[#allocation36_spill]] %s3526_s1 }
   0x3   :  { %3551 = sst [smem:[#allocation37_spill]] %s3527_s2 }
   0x4   :  { %3552 = sst [smem:[#allocation38_spill]] %s3528_s3 }
   0x5   :  { %3553 = sst [smem:[#allocation39_spill]] %s3529_s4 }
   0x6   :  { %3554 = sst [smem:[#allocation40_spill]] %s3530_s5 }
   0x7   :  { %3555 = sst [smem:[#allocation41_spill]] %s3531_s6 }
   0x8   :  { %3556 = sst [smem:[#allocation42_spill]] %s3532_s7 }
   0x9   :  { %3557 = sst [smem:[#allocation43_spill]] %s3533_s8 }
   0xa   :  { %3558 = sst [smem:[#allocation44_spill]] %s3535_s10 }
   0xb   :  { %15 = vsyncpa [#allocation4], 0 }
   0xc   :  { %17 = vsyncpa [#allocation4 + $0x1], 0 }
   0xd   :  { %18 = vsyncpa [#allocation7], 0 }
   0xe   :  { %20 = vsyncpa [#allocation7 + $0x1], 0 }
   0xf   :  { %21 = vsyncpa [#allocation10], 0 }
  0x10   :  { %22 = vsyncpa [#allocation13], 0 }
  0x11   :  { %23 = vsyncpa [#allocation16], 0 }
  0x12   :  { %24 = vsyncpa [#allocation19], 0 }
  0x13   :  { %25 = vsyncpa [#allocation5], 0 }
  0x14   :  { %27 = vsyncpa [#allocation5 + $0x1], 0  ;;  %s2915_s13 = smov 0   ;;  %s2917_s14 = smov 0  }
  0x15   :  { %s2919_s15 = smov 0   ;;  %s2921_s16 = smov 0  }
  0x16   :  { %s2923_s17 = smov 0   ;;  %s2925_s18 = smov 0  }
  0x17   :  { %s2927_s19 = smov 0   ;;  %s2929_s20 = smov 0  }
  0x18   :  { %s2931_s21 = smov 0   ;;  %s2933_s22 = smov 0  }
  0x19   :  { %s2935_s23 = smov 0  }
  0x1a LB: > { %3559 = sst [smem:[#allocation29_spill]] %s2787_s13  ;;  %s2971_s24 = sadd.s32 4294967295, %s2827_s23   ;;  %s2827_s23 = sphi %s2935_s23, %s33_s23   ;;  %s2823_s22 = sphi %s2933_s22, %s3618_s22   ;;  %s2819_s21 = sphi %s2931_s21, %s3617_s21   ;;  %s2815_s20 = sphi %s2929_s20, %s3616_s20   ;;  %s2811_s19 = sphi %s2927_s19, %s3615_s19   ;;  %s2807_s18 = sphi %s2925_s18, %s3614_s18   ;;  %s2803_s17 = sphi %s2923_s17, %s3613_s17   ;;  %s2799_s16 = sphi %s2921_s16, %s3612_s16   ;;  %s2795_s15 = sphi %s2919_s15, %s3611_s15   ;;  %s2791_s14 = sphi %s2917_s14, %s3610_s14   ;;  %s2787_s13 = sphi %s2915_s13, %s3609_s13  }
  0x1b   : > { %3560 = sst [smem:[#allocation30_spill]] %s2791_s14  ;;  %p1989_p0 = scmp.ge.s32.totalorder %s2827_s23, 1 }
  0x1c   : > { %3561 = sst [smem:[#allocation31_spill]] %s2795_s15  ;;  %p3544_p1 = scmp.eq.s32.totalorder %s2971_s24, 0 }
  0x1d   : > { %3562 = sst [smem:[#allocation32_spill]] %s2811_s19  ;;  %p298_p2 = scmp.lt.s32.totalorder %s2827_s23, 5 }
  0x1e   : > { %3563 = sst [smem:[#allocation33_spill]] %s2815_s20  ;;  %s2829_s26 = smov [#allocation8]  }
  0x1f   : > { %p2976_p3 = pnand %p1989_p0, %p298_p2  ;;  %s310_s27 = sshll.u32 %s2829_s26, 4  ;;  %s2980_s27 = int_to_ptr.vmem [resolvable:$true] %s310_s27 }
  0x20   : > { %s2830_s29 = smov [#allocation9]   ;;  %s2831_s11 = smov [#allocation12]  }
  0x21   : > { %s3564_s25 = scalar_select %p2976_p3, 1, 0 }
  0x22   : > { %p2205_p4 = pneg %p2976_p3  ;;  %s324_s30 = sshll.u32 %s2830_s29, 4  ;;  %s2990_s30 = int_to_ptr.vmem [resolvable:$true] %s324_s30 }
  0x23   : > { %3565 = sst [smem:[#allocation34_spill]] %s3564_s25  ;;  %s2992_s12 = sshll.u32 %s2831_s11, 4  ;;  %s349_s12 = int_to_ptr.vmem [resolvable:$true] %s2992_s12 }
  0x24   : > { %p2986_p5 = pnand %p2205_p4, %p3544_p1  ;;  %s3567_s2 = sld [smem:[#allocation37_spill]] }
  0x26   : > { %p3002_p7 = pneg %p2986_p5 }
  0x2a   : > { %s2397_s26 = scalar_lea.hbm %s3567_s2, 256 }
  0x2b   : > { %p2398_p6 = scmp.ne.s32.totalorder %s3567_s2, %s2397_s26  ;;  %p2404_p10 = scmp.lt.u32.totalorder %s2397_s26, %s3567_s2 }
  0x2d   : > { %p2400_p8 = pnand %p3002_p7, %p2398_p6 }
  0x2f   : > { %p2401_p9 = pneg %p2400_p8 }
  0x31   : > { %p2406_p11 = pnand %p2404_p10, %p2401_p9 }
  0x33   : > { %2409 = shalt.err (!%p2406_p11)
}
  0x34   : > { %s2410_s10 = scalar_lea.vmem %s2980_s27, 256  ;;  %p2418_p2 = scmp.lt.s32.totalorder %s2980_s27, %s2980_s27 }
  0x35   : > { %p2411_p12 = scmp.ne.s32.totalorder %s2980_s27, %s2410_s10  ;;  %p2419_p4 = scmp.lt.s32.totalorder %s2410_s10, %s2410_s10 }
  0x37   : > { %p2413_p13 = pnand %p2411_p12, %p3002_p7  ;;  %p2420_p6 = por %p2419_p4, %p2418_p2 }
  0x39   : > { %p2414_p0 = pneg %p2413_p13 }
  0x3b   : > { %p2421_p8 = pnand %p2420_p6, %p2414_p0 }
  0x3d   : > { %2424 = shalt.err (!%p2421_p8)
}
  0x3e   : > { %s3546_s19 = smov 64   ;;  %s2833_s20 = smov 4  }
  0x3f   : > { %2208 = dma.hbm_to_vmem [thread:$0]  (!%p2986_p5), %s3567_s2, 256, %s2980_s27, [#allocation7], %s3546_s19, %s3546_s19, %s2833_s20  }
  0x40   : > { %s3569_s3 = sld [smem:[#allocation38_spill]] }
  0x46   : > { %s2425_s10 = scalar_lea.hbm %s3569_s3, 16 }
  0x47   : > { %p2426_p9 = scmp.ne.s32.totalorder %s3569_s3, %s2425_s10  ;;  %p2432_p12 = scmp.lt.u32.totalorder %s2425_s10, %s3569_s3 }
  0x49   : > { %p2428_p10 = pnand %p2426_p9, %p3002_p7 }
  0x4b   : > { %p2429_p11 = pneg %p2428_p10 }
  0x4d   : > { %p2434_p13 = pnand %p2432_p12, %p2429_p11 }
  0x4f   : > { %2437 = shalt.err (!%p2434_p13)
}
  0x50   : > { %s2438_s27 = scalar_lea.vmem %s2990_s30, 16  ;;  %s2445_s0 = scalar_lea.vmem %s2990_s30, 32 }
  0x51   : > { %p2439_p0 = scmp.ne.s32.totalorder %s2990_s30, %s2438_s27  ;;  %p2446_p6 = scmp.lt.s32.totalorder %s2990_s30, %s2990_s30 }
  0x52   : > { %p2447_p8 = scmp.lt.s32.totalorder %s2445_s0, %s2438_s27 }
  0x53   : > { %p2441_p2 = pnand %p2439_p0, %p3002_p7 }
  0x54   : > { %p2448_p9 = por %p2447_p8, %p2446_p6 }
  0x55   : > { %p2442_p4 = pneg %p2441_p2 }
  0x57   : > { %p2449_p10 = pnand %p2448_p9, %p2442_p4 }
  0x59   : > { %2452 = shalt.err (!%p2449_p10)
}
  0x5a   : > { %2211 = dma.hbm_to_vmem [thread:$0]  (!%p2986_p5), %s3569_s3, 16, %s2990_s30, [#allocation10]  }
  0x5b   : > { %s3570_s5 = sld [smem:[#allocation40_spill]] }
  0x61   : > { %s2453_s26 = scalar_lea.hbm %s3570_s5, 16 }
  0x62   : > { %p2454_p11 = scmp.ne.s32.totalorder %s3570_s5, %s2453_s26  ;;  %p2460_p0 = scmp.lt.u32.totalorder %s2453_s26, %s3570_s5 }
  0x64   : > { %p2456_p12 = pnand %p2454_p11, %p3002_p7 }
  0x66   : > { %p2457_p13 = pneg %p2456_p12 }
  0x68   : > { %p2462_p2 = pnand %p2460_p0, %p2457_p13 }
  0x6a   : > { %2465 = shalt.err (!%p2462_p2)
}
  0x6b   : > { %s2466_s0 = scalar_lea.vmem %s349_s12, 16  ;;  %s2473_s30 = scalar_lea.vmem %s349_s12, 32 }
  0x6c   : > { %p2467_p4 = scmp.ne.s32.totalorder %s349_s12, %s2466_s0  ;;  %p2474_p9 = scmp.lt.s32.totalorder %s349_s12, %s349_s12 }
  0x6d   : > { %p2475_p10 = scmp.lt.s32.totalorder %s2473_s30, %s2466_s0 }
  0x6e   : > { %p2469_p6 = pnand %p2467_p4, %p3002_p7 }
  0x6f   : > { %p2476_p1 = por %p2475_p10, %p2474_p9 }
  0x70   : > { %p2470_p8 = pneg %p2469_p6 }
  0x72   : > { %p2477_p3 = pnand %p2476_p1, %p2470_p8 }
  0x74   : > { %2480 = shalt.err (!%p2477_p3)
}
  0x75   : > { %2217 = dma.hbm_to_vmem [thread:$0]  (!%p2986_p5), %s3570_s5, 16, %s349_s12, [#allocation13]  }
  0x76   : > { %s2834_s15 = smov [#allocation15]   ;;  %s2835_s26 = smov [#allocation11]  }
  0x77   : > { %s372_s25 = sshll.u32 %s2834_s15, 4  ;;  %s334_s29 = sshll.u32 %s2835_s26, 4  ;;  %s373_s25 = int_to_ptr.vmem [resolvable:$true] %s372_s25  ;;  %s335_s29 = int_to_ptr.vmem [resolvable:$true] %s334_s29 }
  0x78   : > { %s3571_s7 = sld [smem:[#allocation42_spill]] }
  0x7e   : > { %s2481_s27 = scalar_lea.hbm %s3571_s7, 16 }
  0x7f   : > { %p2482_p1 = scmp.ne.s32.totalorder %s3571_s7, %s2481_s27  ;;  %p2488_p12 = scmp.lt.u32.totalorder %s2481_s27, %s3571_s7 }
  0x81   : > { %p2484_p3 = pnand %p2482_p1, %p3002_p7 }
  0x83   : > { %p2485_p11 = pneg %p2484_p3 }
  0x85   : > { %p2490_p13 = pnand %p2488_p12, %p2485_p11 }
  0x87   : > { %2493 = shalt.err (!%p2490_p13)
}
  0x88   : > { %s2494_s12 = scalar_lea.vmem %s373_s25, 16  ;;  %s2501_s14 = scalar_lea.vmem %s373_s25, 32 }
  0x89   : > { %p2495_p0 = scmp.ne.s32.totalorder %s373_s25, %s2494_s12  ;;  %p2502_p6 = scmp.lt.s32.totalorder %s373_s25, %s373_s25 }
  0x8a   : > { %p2503_p8 = scmp.lt.s32.totalorder %s2501_s14, %s2494_s12 }
  0x8b   : > { %p2497_p2 = pnand %p2495_p0, %p3002_p7 }
  0x8c   : > { %p2504_p9 = por %p2503_p8, %p2502_p6 }
  0x8d   : > { %p2498_p4 = pneg %p2497_p2 }
  0x8f   : > { %p2505_p10 = pnand %p2504_p9, %p2498_p4 }
  0x91   : > { %2508 = shalt.err (!%p2505_p10)
}
  0x92   : > { %2223 = dma.hbm_to_vmem [thread:$0]  (!%p2986_p5), %s3571_s7, 16, %s373_s25, [#allocation16]  }
  0x93   : > { %s3572_s4 = sld [smem:[#allocation39_spill]] }
  0x99   : > { %s2509_s10 = scalar_lea.hbm %s3572_s4, 256 }
  0x9a   : > { %p2510_p1 = scmp.ne.s32.totalorder %s3572_s4, %s2509_s10  ;;  %p2516_p12 = scmp.lt.u32.totalorder %s2509_s10, %s3572_s4 }
  0x9c   : > { %p2512_p3 = pnand %p2510_p1, %p3002_p7 }
  0x9e   : > { %p2513_p11 = pneg %p2512_p3 }
  0xa0   : > { %p2518_p13 = pnand %p2516_p12, %p2513_p11 }
  0xa2   : > { %2521 = shalt.err (!%p2518_p13)
}
  0xa3   : > { %s2522_s12 = scalar_lea.vmem %s335_s29, 256  ;;  %p2530_p6 = scmp.lt.s32.totalorder %s335_s29, %s335_s29 }
  0xa4   : > { %p2523_p0 = scmp.ne.s32.totalorder %s335_s29, %s2522_s12  ;;  %p2531_p8 = scmp.lt.s32.totalorder %s2522_s12, %s2522_s12 }
  0xa6   : > { %p2525_p2 = pnand %p2523_p0, %p3002_p7  ;;  %p2532_p9 = por %p2531_p8, %p2530_p6 }
  0xa8   : > { %p2526_p4 = pneg %p2525_p2 }
  0xaa   : > { %p2533_p10 = pnand %p2532_p9, %p2526_p4 }
  0xac   : > { %2536 = shalt.err (!%p2533_p10)
}
  0xad   : > { %s3573_s25 = smov 64   ;;  %s2836_s26 = smov [#allocation14]  }
  0xae   : > { %2214 = dma.hbm_to_vmem [thread:$0]  (!%p2986_p5), %s3572_s4, 256, %s335_s29, [#allocation10], %s3573_s25, %s3573_s25, %s2833_s20  }
  0xaf   : > { %s358_s19 = sshll.u32 %s2836_s26, 4  ;;  %s2837_s11 = smov [#allocation17]   ;;  %s359_s19 = int_to_ptr.vmem [resolvable:$true] %s358_s19 }
  0xb0   : > { %s383_s10 = sshll.u32 %s2837_s11, 4  ;;  %s3574_s6 = sld [smem:[#allocation41_spill]]  ;;  %s384_s10 = int_to_ptr.vmem [resolvable:$true] %s383_s10 }
  0xb6   : > { %s2537_s30 = scalar_lea.hbm %s3574_s6, 256 }
  0xb7   : > { %p2538_p1 = scmp.ne.s32.totalorder %s3574_s6, %s2537_s30  ;;  %p2544_p12 = scmp.lt.u32.totalorder %s2537_s30, %s3574_s6 }
  0xb9   : > { %p2540_p3 = pnand %p2538_p1, %p3002_p7 }
  0xbb   : > { %p2541_p11 = pneg %p2540_p3 }
  0xbd   : > { %p2546_p13 = pnand %p2544_p12, %p2541_p11 }
  0xbf   : > { %2549 = shalt.err (!%p2546_p13)
}
  0xc0   : > { %s2550_s29 = scalar_lea.vmem %s359_s19, 256  ;;  %p2558_p6 = scmp.lt.s32.totalorder %s359_s19, %s359_s19 }
  0xc1   : > { %p2551_p0 = scmp.ne.s32.totalorder %s359_s19, %s2550_s29  ;;  %p2559_p8 = scmp.lt.s32.totalorder %s2550_s29, %s2550_s29 }
  0xc3   : > { %p2553_p2 = pnand %p2551_p0, %p3002_p7  ;;  %p2560_p9 = por %p2559_p8, %p2558_p6 }
  0xc5   : > { %p2554_p4 = pneg %p2553_p2 }
  0xc7   : > { %p2561_p10 = pnand %p2560_p9, %p2554_p4 }
  0xc9   : > { %2564 = shalt.err (!%p2561_p10)
}
  0xca   : > { %2220 = dma.hbm_to_vmem [thread:$0]  (!%p2986_p5), %s3574_s6, 256, %s359_s19, [#allocation13], %s3573_s25, %s3573_s25, %s2833_s20  }
  0xcb   : > { %s3575_s8 = sld [smem:[#allocation43_spill]] }
  0xd1   : > { %s2565_s27 = scalar_lea.hbm %s3575_s8, 16 }
  0xd2   : > { %p2566_p1 = scmp.ne.s32.totalorder %s3575_s8, %s2565_s27  ;;  %p2572_p12 = scmp.lt.u32.totalorder %s2565_s27, %s3575_s8 }
  0xd4   : > { %p2568_p3 = pnand %p2566_p1, %p3002_p7 }
  0xd6   : > { %p2569_p11 = pneg %p2568_p3 }
  0xd8   : > { %p2574_p13 = pnand %p2572_p12, %p2569_p11 }
  0xda   : > { %2577 = shalt.err (!%p2574_p13)
}
  0xdb   : > { %s2578_s14 = scalar_lea.vmem %s384_s10, 16  ;;  %s2585_s20 = scalar_lea.vmem %s384_s10, 32 }
  0xdc   : > { %p2579_p0 = scmp.ne.s32.totalorder %s384_s10, %s2578_s14  ;;  %p2586_p6 = scmp.lt.s32.totalorder %s384_s10, %s384_s10 }
  0xdd   : > { %p2587_p8 = scmp.lt.s32.totalorder %s2585_s20, %s2578_s14 }
  0xde   : > { %p2581_p2 = pnand %p2579_p0, %p3002_p7 }
  0xdf   : > { %p2588_p9 = por %p2587_p8, %p2586_p6 }
  0xe0   : > { %p2582_p4 = pneg %p2581_p2 }
  0xe2   : > { %p2589_p10 = pnand %p2588_p9, %p2582_p4 }
  0xe4   : > { %2592 = shalt.err (!%p2589_p10)
}
  0xe5   : > { %2226 = dma.hbm_to_vmem [thread:$0]  (!%p2986_p5), %s3575_s8, 16, %s384_s10, [#allocation16]  }
  0xe6   : > { %s2838_s29 = smov [#allocation18]   ;;  %s2593_s11 = scalar_lea.hbm %s3534_s9, 16 }
  0xe7   : > { %s394_s2 = sshll.u32 %s2838_s29, 4  ;;  %p2594_p1 = scmp.ne.s32.totalorder %s3534_s9, %s2593_s11  ;;  %s395_s2 = int_to_ptr.vmem [resolvable:$true] %s394_s2 }
  0xe8   : > { %p2600_p12 = scmp.lt.u32.totalorder %s2593_s11, %s3534_s9 }
  0xe9   : > { %p2596_p3 = pnand %p2594_p1, %p3002_p7 }
  0xeb   : > { %p2597_p11 = pneg %p2596_p3 }
  0xed   : > { %p2602_p13 = pnand %p2600_p12, %p2597_p11 }
  0xef   : > { %2605 = shalt.err (!%p2602_p13)
}
  0xf0   : > { %s2606_s10 = scalar_lea.vmem %s395_s2, 16  ;;  %s2613_s12 = scalar_lea.vmem %s395_s2, 32 }
  0xf1   : > { %p2607_p0 = scmp.ne.s32.totalorder %s395_s2, %s2606_s10  ;;  %p2614_p6 = scmp.lt.s32.totalorder %s395_s2, %s395_s2 }
  0xf2   : > { %p2615_p8 = scmp.lt.s32.totalorder %s2613_s12, %s2606_s10 }
  0xf3   : > { %p2609_p2 = pnand %p2607_p0, %p3002_p7 }
  0xf4   : > { %p2616_p9 = por %p2615_p8, %p2614_p6 }
  0xf5   : > { %p2610_p4 = pneg %p2609_p2 }
  0xf7   : > { %p2617_p10 = pnand %p2616_p9, %p2610_p4 }
  0xf9   : > { %2620 = shalt.err (!%p2617_p10)
}
  0xfa   : > { %2229 = dma.hbm_to_vmem [thread:$0]  (!%p2986_p5), %s3534_s9, 16, %s395_s2, [#allocation19]  }
  0xfb   : > { %s3576_s1 = sld [smem:[#allocation31_spill]]  ;;  %s1988_s25 = sadd.s32 4294967294, %s2827_s23  }
  0xfc   : > { %s3577_s19 = sld [smem:[#allocation30_spill]]  ;;  %s42_s28 = sadd.s32 1, %s2819_s21 }
  0xfd   : > { %p43_p7 = scmp.ge.s32.totalorder %s42_s28, 2  ;;  %s45_s29 = sadd.s32 1, %s2823_s22 }
  0xfe   : > { %s52_s15 = sadd.s32 1, %s2807_s18  ;;  %p59_p1 = scmp.ne.s32.totalorder %s2807_s18, %s2803_s17 }
  0xff   : > { %s3620_s28 = smov (%p43_p7, %s42_s28), 0  ;;  %s3622_s29 = smov (!%p43_p7, %s45_s29), %s2823_s22 }
 0x100   : > { %p60_p3 = scmp.eq.s32.totalorder %s2827_s23, 0  ;;  %p65_p11 = scmp.ne.s32.totalorder %s2803_s17, %s2799_s16 }
 0x101   : > { %s3578_s2 = sld [smem:[#allocation29_spill]]  ;;  %p47_p5 = scmp.ge.s32.totalorder %s3622_s29, 2 }
 0x102   : > { %s270_s26 = ssub.s32 %s2819_s21, %s3620_s28  ;;  %p3179_p12 = por %p60_p3, %p59_p1 }
 0x103   : > { %p3580_p13 = scmp.eq.s32.totalorder %s2971_s24, 0  ;;  %s3624_s29 = smov (%p47_p5, %s3622_s29), 0 }
 0x104   : > { %s274_s16 = sadd.s32 1, %s3576_s1  ;;  %p284_p2 = scmp.ne.s32.totalorder %s3576_s1, %s3577_s19 }
 0x105   : > { %p3185_p0 = por %p3580_p13, %p65_p11  ;;  %s49_s0 = ssub.s32 %s2823_s22, %s3624_s29 }
 0x106   : > { %p285_p4 = scmp.eq.s32.totalorder %s2971_s24, 3  ;;  %p50_p6 = scmp.eq.s32.totalorder %s49_s0, 0 }
 0x107   : > { %s271_s30 = sor.u32 %s270_s26, %s49_s0  ;;  %p290_p10 = scmp.ne.s32.totalorder %s3577_s19, %s3578_s2 }
 0x108   : > { %p272_p8 = scmp.eq.s32.totalorder %s271_s30, 0  ;;  %p3197_p9 = por %p285_p4, %p284_p2 }
 0x109   : > { %s3202_s10 = scalar_select %p50_p6, %s2807_s18, %s52_s15  }
 0x10a   : > { %s3582_s13 = scalar_select %p3197_p9, 1, 0 }
 0x10b   : > { %s3626_s1 = smov (!%p272_p8, %s3576_s1), %s274_s16  ;;  %p291_p7 = scmp.eq.s32.totalorder %s1988_s25, 3 }
 0x10c   : > { %p2249_p1 = scmp.lt.s32.totalorder %s2827_s23, 4  ;;  %s3211_s12 = sand.u32 1, %s2807_s18  }
 0x10d   : > { %p3213_p3 = por %p291_p7, %p290_p10  ;;  %s1999_s20 = sshll.u32 %s2823_s22, 4 }
 0x10e   : > { %s3584_s30 = sld [smem:[#allocation35_spill]]  ;;  %s408_s25 = scalar_lea.vmem [#allocation3], %s3211_s12 }
 0x10f   : > { %s3583_s14 = scalar_select %p3213_p3, 1, 0 }
 0x110   : > { %s415_s19 = sshll.u32 %s408_s25, 4  ;;  %p3228_p11 = pnand %p2249_p1, %p3179_p12  ;;  %s3224_s19 = int_to_ptr.vmem [resolvable:$true] %s415_s19 }
 0x111   : > { %s2000_s16 = sshll.u32 %s3211_s12, 4  ;;  %s406_s26 = scalar_lea.sflag [#allocation4], %s3211_s12 }
 0x112   : > { %p2623_p13 = pneg %p3228_p11 }
 0x114   : > { %s3221_s15 = scalar_lea.hbm %s3584_s30, %s1999_s20  ;;  %s2626_s11 = scalar_lea.hbm %s3584_s30, 32 }
 0x115   : > { %s2621_s20 = scalar_lea.hbm %s3221_s15, 16  ;;  %p2627_p12 = scmp.lt.u32.totalorder %s3221_s15, %s3584_s30 }
 0x116   : > { %p2622_p5 = scmp.ne.s32.totalorder %s3221_s15, %s2621_s20  ;;  %p2628_p6 = scmp.lt.u32.totalorder %s2626_s11, %s2621_s20 }
 0x117   : > { %p2630_p10 = scmp.lt.u32.totalorder %s2621_s20, %s3221_s15 }
 0x118   : > { %p2624_p2 = pnand %p2623_p13, %p2622_p5  ;;  %p2629_p8 = por %p2628_p6, %p2627_p12 }
 0x11a   : > { %p2625_p4 = pneg %p2624_p2  ;;  %p2631_p7 = por %p2630_p10, %p2629_p8 }
 0x11c   : > { %p2632_p1 = pnand %p2631_p7, %p2625_p4 }
 0x11e   : > { %2635 = shalt.err (!%p2632_p1)
}
 0x11f   : > { %s2636_s3 = scalar_lea.vmem %s3224_s19, 16  ;;  %s2839_s0 = smov [#allocation3]  }
 0x120   : > { %p2637_p5 = scmp.ne.s32.totalorder %s3224_s19, %s2636_s3  ;;  %s2641_s25 = sshll.u32 %s2839_s0, 4  ;;  %s2642_s25 = int_to_ptr.vmem [resolvable:$false] %s2641_s25 }
 0x121   : > { %s2643_s4 = scalar_lea.vmem %s2642_s25, 32  ;;  %p2644_p9 = scmp.lt.s32.totalorder %s3224_s19, %s2642_s25 }
 0x122   : > { %p2639_p2 = pnand %p2637_p5, %p2623_p13  ;;  %p2645_p12 = scmp.lt.s32.totalorder %s2643_s4, %s2636_s3 }
 0x124   : > { %p2640_p3 = pneg %p2639_p2  ;;  %p2646_p6 = por %p2645_p12, %p2644_p9 }
 0x126   : > { %p2647_p8 = pnand %p2646_p6, %p2640_p3 }
 0x128   : > { %2650 = shalt.err (!%p2647_p8)
}
 0x129   : > { %2233 = dma.hbm_to_vmem [thread:$0]  (!%p3228_p11), %s3221_s15, 16, %s3224_s19, %s406_s26  }
 0x12a   : > { %s426_s5 = scalar_lea.vmem [#allocation6], %s2000_s16  ;;  %s2048_s11 = sshll.u32 %s2823_s22, 8 }
 0x12b   : > { %s433_s20 = sshll.u32 %s426_s5, 4  ;;  %s3586_s25 = sld [smem:[#allocation36_spill]]  ;;  %s3262_s20 = int_to_ptr.vmem [resolvable:$true] %s433_s20 }
 0x12c   : > { %s3587_s6 = sand.u32 1, %s2827_s23  }
 0x12d   : > { %s3272_s7 = scalar_lea.sflag [#allocation7], %s3587_s6 }
 0x131   : > { %s3268_s4 = scalar_lea.hbm %s3586_s25, %s2048_s11  ;;  %s2656_s19 = scalar_lea.hbm %s3586_s25, 512 }
 0x132   : > { %s2651_s8 = scalar_lea.hbm %s3268_s4, 256  ;;  %p2657_p10 = scmp.lt.u32.totalorder %s3268_s4, %s3586_s25 }
 0x133   : > { %p2652_p9 = scmp.ne.s32.totalorder %s3268_s4, %s2651_s8  ;;  %p2658_p7 = scmp.lt.u32.totalorder %s2656_s19, %s2651_s8 }
 0x134   : > { %p2660_p5 = scmp.lt.u32.totalorder %s2651_s8, %s3268_s4 }
 0x135   : > { %p2654_p3 = pnand %p2652_p9, %p2623_p13  ;;  %p2659_p1 = por %p2658_p7, %p2657_p10 }
 0x137   : > { %p2655_p4 = pneg %p2654_p3  ;;  %p2661_p2 = por %p2660_p5, %p2659_p1 }
 0x139   : > { %p2662_p12 = pnand %p2661_p2, %p2655_p4 }
 0x13b   : > { %2665 = shalt.err (!%p2662_p12)
}
 0x13c   : > { %s2666_s6 = scalar_lea.vmem %s3262_s20, 256  ;;  %s2840_s5 = smov [#allocation6]  }
 0x13d   : > { %p2667_p6 = scmp.ne.s32.totalorder %s3262_s20, %s2666_s6  ;;  %s2671_s11 = sshll.u32 %s2840_s5, 4  ;;  %s2672_s11 = int_to_ptr.vmem [resolvable:$false] %s2671_s11 }
 0x13e   : > { %s2673_s0 = scalar_lea.vmem %s2672_s11, 512  ;;  %p2674_p3 = scmp.lt.s32.totalorder %s3262_s20, %s2672_s11 }
 0x13f   : > { %p2669_p8 = pnand %p2667_p6, %p2623_p13  ;;  %p2675_p10 = scmp.lt.s32.totalorder %s2673_s0, %s2666_s6 }
 0x141   : > { %p2670_p9 = pneg %p2669_p8  ;;  %p2676_p7 = por %p2675_p10, %p2674_p3 }
 0x143   : > { %p2677_p1 = pnand %p2676_p7, %p2670_p9 }
 0x145   : > { %2680 = shalt.err (!%p2677_p1)
}
 0x146   : > { %s2841_s8 = smov 128   ;;  %s2842_s3 = smov 8  }
 0x147   : > { %2236 = dma.hbm_to_vmem [thread:$0]  (!%p3228_p11), %s3268_s4, 256, %s3262_s20, %s3272_s7, %s2841_s8, %s2841_s8, %s2842_s3  }
 0x148   : > { %s3588_s12 = sld [smem:[#allocation34_spill]] }
 0x14e   : > { %p3589_p13 = scmp.ne.s32.totalorder %s3588_s12, 0 }
 0x14f   : > { %s3301_s15 = sand.u32 (!%p3589_p13), 1, %s2803_s17  }
 0x150   : > { %445 = sbr.rel (%p3589_p13) target bundleno = 2415 (0x96f), region = 60  ;;  %s448_s19 = scalar_lea.sflag (!%p3589_p13), [#allocation4], %s3301_s15 }
 0x151   : > { %s450_s16 = scalar_lea.vmem (!%p3589_p13), [#allocation3], %s3301_s15 }
 0x157   : > { %2754 = dma.done.wait (%p3185_p0), %s448_s19, 16  }
 0x158   : > { %2756 = vsyncadd (%p3185_p0), %s448_s19, 4294967280  ;;  %s455_s7 = sand.u32 1, %s2971_s24   ;;  %s2004_s2 = sshll.u32 %s3301_s15, 4 }
 0x159   : > { %s456_s20 = scalar_lea.sflag [#allocation7], %s455_s7  ;;  %s3311_s4 = scalar_lea.vmem [#allocation6], %s2004_s2 }
 0x15a   : > { %2758 = dma.done.wait (%p3185_p0), %s456_s20, 256  }
 0x15b   : > { %2760 = vsyncadd (%p3185_p0), %s456_s20, 4294967040  ;;  %p3590_p11 = scmp.eq.s32.totalorder %s2971_s24, 0 }
 0x15d   : > { %2762 = dma.done.wait (%p3590_p11), [#allocation7], 256   ;;  %p3591_p4 = pmov %p3590_p11 }
 0x15f   : > { %2764 = vsyncadd (%p3591_p4), [#allocation7], 4294967040  ;;  %p3592_p5 = pmov %p3591_p4 }
 0x160   : > { %p3593_p2 = pmov %p3591_p4 }
 0x161   : > { %2766 = dma.done.wait (%p3592_p5), [#allocation10], 272  }
 0x162   : > { %2768 = vsyncadd (%p3593_p2), [#allocation10], 4294967024  ;;  %p3594_p12 = pmov %p3593_p2 }
 0x163   : > { %p3595_p6 = pmov %p3593_p2 }
 0x164   : > { %2770 = dma.done.wait (%p3594_p12), [#allocation13], 272  }
 0x165   : > { %2772 = vsyncadd (%p3595_p6), [#allocation13], 4294967024  ;;  %p3596_p0 = pmov %p3593_p2 }
 0x167   : > { %2774 = dma.done.wait (%p3596_p0), [#allocation16], 32   ;;  %p3597_p8 = pmov %p3596_p0 }
 0x168   : > { %p3598_p9 = pmov %p3596_p0 }
 0x169   : > { %2776 = vsyncadd (%p3597_p8), [#allocation16], 4294967264 }
 0x16a   : > { %2778 = dma.done.wait (%p3598_p9), [#allocation19], 16   ;;  %p3599_p3 = pmov %p3596_p0 }
 0x16b   : > { %s3600_s27 = sld [smem:[#allocation30_spill]]  ;;  %s3601_s11 = sld [smem:[#allocation32_spill]] }
 0x16c   : > { %2780 = vsyncadd (%p3599_p3), [#allocation19], 4294967280 }
 0x171   : > { %s529_s26 = sand.u32 1, %s3600_s27   ;;  %p2014_p10 = scmp.ne.s32.totalorder %s3601_s11, 0 }
 0x172   : > { %s3340_s6 = sshll.u32 %s529_s26, 3  ;;  %v2375_v0 = vld [vmem:[#allocation11] sm:$0xff] (!%p2014_p10)   ;;  %v2843_v1 = vmov (!%p2014_p10), 0.0   ;;  %v2376_v2 = vld [vmem:[#allocation11 + $0x8] sm:$0xff] (!%p2014_p10)   ;;  %vm2844_vm0 = vmmov (!%p2014_p10), 0   ;;  %vm563_vm1 = vcmask (!%p2014_p10), 261120   ;;  %v642_v16 = vlaneseq (!%p2014_p10) }
 0x173   : > { %s531_s5 = scalar_lea.vmem [#allocation20], %s3340_s6  ;;  %536 = sbr.rel (%p2014_p10) target bundleno = 744 (0x2e8), region = 104  ;;  %2079 = vmatprep.subr.bf16.mxu0 (!%p2014_p10), %v2843_v1  ;;  %2083 = vmatprep.mubr.msk.bf16.mxu0 (!%p2014_p10), %vm2844_vm0, %v2843_v1  ;;  %v537_v3 = vld [vmem:[%s3311_s4] sm:$0xff] (!%p2014_p10)  ;;  %v538_v4 = vld [vmem:[%s3311_s4 + $0x8] sm:$0xff] (!%p2014_p10)  ;;  %v2848_v14 = vmov (!%p2014_p10), 1983009808  }
 0x174   : > { %2080 = vmatpush3.bf16.msra.mxu0 (!%p2014_p10), %v2375_v0  ;;  %v539_v5 = vpack.c.bf16 (!%p2014_p10), %v538_v4, %v537_v3  ;;  %v2015_v6 = vld [vmem:[#allocation12] ss:$0 sm:$0xff] (!%p2014_p10)  ;;  %s2845_s24 = smov (!%p2014_p10), 104   ;;  %s2846_s0 = smov (!%p2014_p10), 120   ;;  %v640_v15 = vunpack.c.l.s4 (!%p2014_p10), %v2848_v14  ;;  %v643_v18 = vshrl.u32 (!%p2014_p10), %v642_v16, 7  ;;  %v2850_v22 = vmov (!%p2014_p10), 0  }
 0x175   : > { %2081 = vmatprep.subr.bf16.mxu0 (!%p2014_p10), %v2843_v1  ;;  %s2847_s8 = smov (!%p2014_p10), 112   ;;  %v2849_v19 = vmov (!%p2014_p10), 1934713408   ;;  %v633_v23 = vpack.i.b16 (!%p2014_p10), %v2850_v22, %v2850_v22  ;;  %vm886_vm2 = vcmask (!%p2014_p10), 64512  }
 0x176   : > { %v641_v17 = vunpack.c.0.s8 (!%p2014_p10), %v640_v15  ;;  %v671_v20 = vunpack.c.l.s4 (!%p2014_p10), %v2849_v19 }
 0x178   : > { %2082 = vmatpush3.bf16.msra.mxu0 (!%p2014_p10), %v2376_v2  ;;  %v644_v28 = vsub.s32 (!%p2014_p10), %v641_v17, %v643_v18  ;;  %v672_v29 = vunpack.c.0.s8 (!%p2014_p10), %v671_v20 }
 0x17a   : > { %v675_v37 = vsub.s32 %v672_v29, %v643_v18 }
 0x17b   : > { %2084 = vmatmul.mubr.msk.bf16.vlgmr.msra.gmra.mrb[0].mxu0 %vm563_vm1, %v539_v5 }
 0x24e   : > { %v601_v7 = vpop.f32.mrb[0].mxu0 }
 0x24f   : > { %v2085_v8 = vpop.f32.mrb[1].mxu0  ;;  %v602_v10 = vadd.f32 %v2015_v6, %v601_v7 }
 0x250   : > { %v604_v9 = vpop.f32.mrb[2].mxu0 }
 0x251   : > { %v605_v11 = vadd.f32 %v2015_v6, %v604_v9  ;;  %v2086_v12 = vpop.f32.mrb[3].mxu0 }
 0x253   : > { %v608_v13 = vpack.c.bf16 %v605_v11, %v602_v10 }
 0x255   : > { %614 = vrot.lane.b32.xlu1 %v608_v13, %s2845_s24  ;;  %610 = vrot.lane.b32.xlu0 %v608_v13, %s2846_s0  ;;  %v620_v26 = vshrl.u32 %v608_v13, 16 }
 0x259   : > { %612 = vrot.lane.b32.xlu0 %v608_v13, %s2847_s8 }
 0x2c7   : > { %v611_v21 = vpop.permute.xlu0 %610  ;;  %v615_v27 = vpop.permute.xlu1 %614 }
 0x2c8   : > { %v618_v24 = vpack.i.b16 %v611_v21, %v608_v13  ;;  %v621_v25 = vshrl.u32 %v611_v21, 16  ;;  %v629_v34 = vshrl.u32 %v615_v27, 16 }
 0x2ca   : > { %v622_v30 = vpack.i.b16 %v621_v25, %v620_v26  ;;  %v638_v32 = vcombine.high %v618_v24, %v633_v23  ;;  %v645_v36 = vrot.slane %v618_v24, %v644_v28 }
 0x2cb   : > { %v613_v31 = vpop.permute.xlu0 %612 }
 0x2cc   : > { %v626_v33 = vpack.i.b16 %v615_v27, %v613_v31  ;;  %v628_v35 = vshrl.u32 %v613_v31, 16  ;;  %v704_v40 = vcombine.high %v622_v30, %v633_v23  ;;  %v652_v42 = vrot.slane %v638_v32, %v644_v28 }
 0x2cd   : > { %v711_v46 = vrot.slane %v622_v30, %v644_v28 }
 0x2ce   : > { %v653_v38 = vcombine.high %v626_v33, %v633_v23  ;;  %v660_v39 = vrot.slane %v626_v33, %v644_v28  ;;  %v630_v41 = vpack.i.b16 %v629_v34, %v628_v35  ;;  %v718_v53 = vrot.slane %v704_v40, %v644_v28 }
 0x2d0   : > { %v667_v43 = vrot.slane %v653_v38, %v644_v28  ;;  %v668_v44 = vcombine.low %v645_v36, %v660_v39  ;;  %v669_v45 = vcombine.high %v645_v36, %v660_v39  ;;  %v719_v47 = vcombine.high %v630_v41, %v633_v23 }
 0x2d1   : > { %v726_v48 = vrot.slane %v630_v41, %v644_v28 }
 0x2d2   : > { %v676_v49 = vrot.slane %v668_v44, %v675_v37  ;;  %v683_v50 = vrot.slane %v669_v45, %v675_v37  ;;  %v684_v51 = vcombine.low %v652_v42, %v667_v43  ;;  %v685_v52 = vcombine.high %v652_v42, %v667_v43 }
 0x2d3   : > { %v733_v54 = vrot.slane %v719_v47, %v644_v28  ;;  %v734_v55 = vcombine.low %v711_v46, %v726_v48  ;;  %v735_v56 = vcombine.high %v711_v46, %v726_v48 }
 0x2d4   : > { %v692_v57 = vrot.slane %v684_v51, %v675_v37  ;;  %v699_v58 = vrot.slane %v685_v52, %v675_v37  ;;  %v770_v59 = vcombine.low %v676_v49, %v683_v50  ;;  %v2019_v60 = vcombine.high %v676_v49, %v683_v50 }
 0x2d5   : > { %v742_v61 = vrot.slane %v734_v55, %v675_v37  ;;  %v749_v62 = vrot.slane %v735_v56, %v675_v37  ;;  %v750_v63 = vcombine.low %v718_v53, %v733_v54  ;;  %v751_v0 = vcombine.high %v718_v53, %v733_v54 }
 0x2d6   : > { %v777_v1 = vrot.slane %v770_v59, %v644_v28  ;;  %v785_v2 = vrot.slane %v2019_v60, %v644_v28  ;;  %v786_v3 = vcombine.low %v692_v57, %v699_v58  ;;  %v2020_v4 = vcombine.high %v692_v57, %v699_v58 }
 0x2d7   : > { %v758_v5 = vrot.slane %v750_v63, %v675_v37  ;;  %v765_v6 = vrot.slane %v751_v0, %v675_v37  ;;  %v820_v7 = vcombine.low %v742_v61, %v749_v62  ;;  %v2021_v8 = vcombine.high %v742_v61, %v749_v62 }
 0x2d8   : > { %v793_v9 = vrot.slane %v786_v3, %v644_v28  ;;  %v801_v10 = vrot.slane %v2020_v4, %v644_v28  ;;  %v802_v11 = vcombine.low %v777_v1, %v785_v2 }
 0x2d9   : > { %v827_v12 = vrot.slane %v820_v7, %v644_v28  ;;  %v835_v13 = vrot.slane %v2021_v8, %v644_v28  ;;  %v836_v14 = vcombine.low %v758_v5, %v765_v6  ;;  %v2022_v15 = vcombine.high %v758_v5, %v765_v6 }
 0x2da   : > { %v810_v16 = vcombine.low %v793_v9, %v801_v10  ;;  %v809_v20 = vrot.slane %v802_v11, %v675_v37 }
 0x2db   : > { %v843_v17 = vrot.slane %v836_v14, %v644_v28  ;;  %v851_v18 = vrot.slane %v2022_v15, %v644_v28  ;;  %v852_v19 = vcombine.low %v827_v12, %v835_v13 }
 0x2dc   : > { %v817_v21 = vrot.slane %v810_v16, %v675_v37 }
 0x2dd   : > { %v860_v22 = vcombine.low %v843_v17, %v851_v18  ;;  %v859_v25 = vrot.slane %v852_v19, %v675_v37 }
 0x2de   : > { %v818_v23 = vcombine.low %v809_v20, %v817_v21  ;;  %v819_v24 = vcombine.high %v809_v20, %v817_v21 }
 0x2df   : > { %v867_v26 = vrot.slane %v860_v22, %v675_v37 }
 0x2e0   : > { %v874_v30 = vshrl.u32 %v818_v23, 16  ;;  %v882_v31 = vshrl.u32 %v819_v24, 16 }
 0x2e1   : > { %v868_v27 = vcombine.low %v859_v25, %v867_v26  ;;  %v869_v29 = vcombine.high %v859_v25, %v867_v26 }
 0x2e3   : > { %v872_v32 = vpack.i.b16 %v868_v27, %v818_v23  ;;  %v875_v33 = vshrl.u32 %v868_v27, 16  ;;  %v880_v34 = vpack.i.b16 %v869_v29, %v819_v24  ;;  %v883_v35 = vshrl.u32 %v869_v29, 16 }
 0x2e5   : > { %v876_v36 = vpack.i.b16 %v875_v33, %v874_v30  ;;  %v884_v38 = vpack.i.b16 %v883_v35, %v882_v31  ;;  %887 = vst.msk [vmem:[#allocation2] sm:$0xff] %vm886_vm2, %v872_v32  ;;  %889 = vst.msk [vmem:[#allocation2 + $0x10] sm:$0xff] %vm886_vm2, %v880_v34 }
 0x2e7   : > { %888 = vst.msk [vmem:[#allocation2 + $0x8] sm:$0xff] %vm886_vm2, %v876_v36  ;;  %890 = vst.msk [vmem:[#allocation2 + $0x18] sm:$0xff] %vm886_vm2, %v884_v38 }
 0x2e8 PF: > { %v2377_v28 = vld [vmem:[#allocation8] sm:$0xff]   ;;  %s3602_s3 = sld [smem:[#allocation32_spill]]  ;;  %v2851_v37 = vmov 0.0   ;;  %v2378_v39 = vld [vmem:[#allocation8 + $0x8] sm:$0xff]   ;;  %vm2852_vm3 = vmmov 0   ;;  %vm918_vm4 = vcmask 261120   ;;  %v974_v56 = vlaneseq }
 0x2e9   : > { %2087 = vmatprep.subr.bf16.mxu0 %v2851_v37  ;;  %2095 = vmatprep.subr.bf16.mxu1 %v2851_v37  ;;  %v2024_v42 = vld [vmem:[#allocation9] ss:$0 sm:$0xff]  ;;  %s2853_s7 = smov 104   ;;  %s2854_s2 = smov 120   ;;  %vm1144_vm5 = vcmask 64512   ;;  %v2858_v13 = vmov 0  }
 0x2ea   : > { %2088 = vmatpush3.bf16.msra.mxu0 %v2377_v28  ;;  %2091 = vmatprep.mubr.msk.bf16.mxu0 %vm2852_vm3, %v2851_v37  ;;  %s2855_s20 = smov 112   ;;  %v2856_v54 = vmov 1983009808   ;;  %v2857_v57 = vmov 1934713408   ;;  %v3373_v60 = vshrl.u32 %v974_v56, 7 }
 0x2eb   : > { %2089 = vmatprep.subr.bf16.mxu0 %v2851_v37  ;;  %2097 = vmatprep.mubr.msk.bf16.mxu1 %vm2852_vm3, %v2851_v37  ;;  %v972_v55 = vunpack.c.l.s4 %v2856_v54  ;;  %v989_v58 = vunpack.c.l.s4 %v2857_v57  ;;  %vm1329_vm6 = vcmask 130048   ;;  %vm1561_vm7 = vcmask 1043456   ;;  %s3603_s15 = sld [smem:[#allocation33_spill]]  ;;  %s1806_s24 = sshll.u32 %s531_s5, 4  ;;  %s3460_s24 = int_to_ptr.vmem [resolvable:$true] %s1806_s24 }
 0x2ec   : > { %v3363_v50 = vld [vmem:[#allocation2] sm:$0xff]  ;;  %p3606_p1 = scmp.ne.s32.totalorder %s3582_s13, 0 }
 0x2ed   : > { %v1149_v52 = vsel %vm1144_vm5, %v3363_v50, 0  ;;  %v973_v59 = vunpack.c.0.s8 %v972_v55  ;;  %v990_v61 = vunpack.c.0.s8 %v989_v58 }
 0x2ee   : > { %s2023_s12 = sshll.u32 %s3602_s3, 3  ;;  %2090 = vmatpush3.bf16.msra.mxu0 %v2378_v39  ;;  %v3365_v51 = vld [vmem:[#allocation2 + $0x8] sm:$0xff]  ;;  %2096 = vmatpush3.bf16.xpose.msra.mxu1 %v1149_v52 }
 0x2ef   : > { %s892_s19 = scalar_lea.vmem %s3311_s4, %s2023_s12 [#allocation6]  ;;  %2101 = vmatprep.subr.bf16.mxu0 %v2851_v37  ;;  %v1195_v53 = vsel %vm1144_vm5, %v3365_v51, 0  ;;  %2107 = vmatprep.subr.bf16.mxu1 %v2851_v37  ;;  %v976_v62 = vsub.s32 %v973_v59, %v3373_v60  ;;  %v993_v2 = vsub.s32 %v990_v61, %v3373_v60  ;;  %s3605_s12 = sld [smem:[#allocation44_spill]] }
 0x2f0   : > { %v3355_v40 = vld [vmem:[%s892_s19] sm:$0xff] }
 0x2f1   : > { %v894_v41 = vpack.c.bf16 %v3355_v40, %v3355_v40  ;;  %s2044_s4 = sshll.u32 %s3603_s15, 1 }
 0x2f2   : > { %s1802_s27 = sadd.s32 %s3602_s3, %s2044_s4  ;;  %s1791_s3 = scalar_lea.sflag [#allocation5], %s529_s26 }
 0x2f3   : > { %2092 = vmatmul.mubr.msk.bf16.vlgmr.msra.gmra.mrb[0].mxu0 %vm918_vm4, %v894_v41  ;;  %s2045_s11 = sshll.u32 %s1802_s27, 7 }
 0x2f4   : > { %2103 = vmatprep.mubr.msk.bf16.mxu0 %vm2852_vm3, %v2851_v37 }
 0x2f5   : > { %s3458_s19 = scalar_lea.hbm %s3605_s12, %s2045_s11 }
 0x2f7   : > { %2102 = vmatpush3.bf16.xpose.msra.mxu0 %v1195_v53  ;;  %v3379_v53 = vld [vmem:[#allocation2 + $0x18] sm:$0xff] }
 0x2f8   : > { %2113 = vmatprep.subr.bf16.mxu0 %v2851_v37  ;;  %v1287_v59 = vsel %vm1144_vm5, %v3379_v53, 0 }
 0x3c6   : > { %v956_v43 = vpop.f32.mrb[0].mxu0 }
 0x3c7   : > { %v957_v44 = vadd.f32 %v2024_v42, %v956_v43  ;;  %v2093_v45 = vpop.f32.mrb[1].mxu0 }
 0x3c8   : > { %v959_v46 = vpop.f32.mrb[2].mxu0 }
 0x3c9   : > { %v962_v47 = vmul.f32 0.35355338, %v957_v44  ;;  %v2094_v48 = vpop.f32.mrb[3].mxu0 }
 0x3cb   : > { %v963_v49 = vpack.c.bf16 %v962_v47, %v962_v47 }
 0x3cd   : > { %969 = vrot.lane.b32.xlu1 %v963_v49, %s2853_s7  ;;  %965 = vrot.lane.b32.xlu0 %v963_v49, %s2854_s2  ;;  %v977_v9 = vrot.slane %v963_v49, %v976_v62  ;;  %s2681_s7 = scalar_lea.vmem %s3460_s24, 128  ;;  %s2859_s2 = smov [#allocation20]  }
 0x3ce   : > { %p2682_p7 = scmp.ne.s32.totalorder %s3460_s24, %s2681_s7 }
 0x3d0   : > { %p2683_p13 = pnand %p2682_p7, %p3606_p1 }
 0x3d1   : > { %967 = vrot.lane.b32.xlu0 %v963_v49, %s2855_s20  ;;  %v3377_v49 = vld [vmem:[#allocation2 + $0x10] sm:$0xff]  ;;  %s2685_s20 = sshll.u32 %s2859_s2, 4  ;;  %s2686_s20 = int_to_ptr.vmem [resolvable:$false] %s2685_s20 }
 0x3d2   : > { %v1241_v55 = vsel %vm1144_vm5, %v3377_v49, 0  ;;  %p2684_p11 = pneg %p2683_p13  ;;  %s2687_s15 = scalar_lea.vmem %s2686_s20, 256 }
 0x3d3   : > { %p2688_p4 = scmp.lt.s32.totalorder %s3460_s24, %s2686_s20  ;;  %p2689_p5 = scmp.lt.s32.totalorder %s2687_s15, %s2681_s7 }
 0x3d5   : > { %p2690_p2 = por %p2689_p5, %p2688_p4 }
 0x3d7   : > { %p2691_p12 = pnand %p2690_p2, %p2684_p11 }
 0x43f   : > { %v970_v63 = vpop.permute.xlu1 %969  ;;  %v966_v0 = vpop.permute.xlu0 %965 }
 0x440   : > { %v1019_v1 = vrot.slane %v970_v63, %v976_v62  ;;  %v1011_v3 = vrot.slane %v966_v0, %v976_v62 }
 0x442   : > { %v1020_v4 = vcombine.low %v1011_v3, %v1019_v1  ;;  %v1021_v5 = vcombine.high %v1011_v3, %v1019_v1  ;;  %v1136_v3 = vld [vmem:[%s450_s16] sm:$0x1] }
 0x443   : > { %v968_v6 = vpop.permute.xlu0 %967 }
 0x444   : > { %v1028_v7 = vrot.slane %v1020_v4, %v993_v2  ;;  %v985_v8 = vrot.slane %v968_v6, %v976_v62  ;;  %v1035_v10 = vrot.slane %v1021_v5, %v993_v2  ;;  %v1137_v4 = vmul.f32 -1e+10, %v1136_v3 }
 0x445   : > { %v1141_v5 = vsub.s32 0, %v3373_v60 }
 0x446   : > { %v986_v11 = vcombine.low %v977_v9, %v985_v8  ;;  %v987_v12 = vcombine.high %v977_v9, %v985_v8  ;;  %v1036_v14 = vcombine.high %v1028_v7, %v2858_v13  ;;  %v1037_v17 = vcombine.high %v1035_v10, %v2858_v13 }
 0x447   : > { %v1043_v18 = vshrl.u32 %v1028_v7, 16  ;;  %v1059_v24 = vshrl.u32 %v1035_v10, 16 }
 0x448   : > { %v994_v15 = vrot.slane %v986_v11, %v993_v2  ;;  %v1001_v16 = vrot.slane %v987_v12, %v993_v2  ;;  %v1051_v23 = vshrl.u32 %v1036_v14, 16  ;;  %v1067_v32 = vshrl.u32 %v1037_v17, 16 }
 0x44a   : > { %v1002_v19 = vcombine.high %v994_v15, %v2858_v13  ;;  %v1003_v20 = vcombine.high %v1001_v16, %v2858_v13  ;;  %v1040_v21 = vpack.i.b16 %v1028_v7, %v994_v15  ;;  %v1042_v22 = vshrl.u32 %v994_v15, 16 }
 0x44b   : > { %v1056_v25 = vpack.i.b16 %v1035_v10, %v1001_v16  ;;  %v1058_v26 = vshrl.u32 %v1001_v16, 16 }
 0x44c   : > { %v1044_v27 = vpack.i.b16 %v1043_v18, %v1042_v22  ;;  %v1048_v29 = vpack.i.b16 %v1036_v14, %v1002_v19  ;;  %v1050_v30 = vshrl.u32 %v1002_v19, 16  ;;  %v1064_v31 = vpack.i.b16 %v1037_v17, %v1003_v20 }
 0x44d   : > { %v1060_v33 = vpack.i.b16 %v1059_v24, %v1058_v26  ;;  %v1066_v34 = vshrl.u32 %v1003_v20, 16  ;;  %v1070_v35 = vcombine.low %v1040_v21, %v1056_v25 }
 0x44e   : > { %v1052_v36 = vpack.i.b16 %v1051_v23, %v1050_v30  ;;  %v1078_v38 = vcombine.low %v1048_v29, %v1064_v31 }
 0x44f   : > { %v1068_v28 = vpack.i.b16 %v1067_v32, %v1066_v34  ;;  %v1095_v39 = vcombine.low %v1044_v27, %v1060_v33  ;;  %v1077_v41 = vrot.slane %v1070_v35, %v976_v62 }
 0x450   : > { %v1085_v42 = vrot.slane %v1078_v38, %v976_v62 }
 0x451   : > { %v1103_v43 = vcombine.low %v1052_v36, %v1068_v28  ;;  %v1102_v45 = vrot.slane %v1095_v39, %v976_v62 }
 0x452   : > { %v1086_v44 = vcombine.low %v1077_v41, %v1085_v42 }
 0x453   : > { %v1110_v46 = vrot.slane %v1103_v43, %v976_v62 }
 0x454   : > { %v1093_v47 = vrot.slane %v1086_v44, %v993_v2 }
 0x455   : > { %v1111_v48 = vcombine.low %v1102_v45, %v1110_v46 }
 0x456   : > { %v1123_v56 = vshrl.u32 %v1093_v47, 16  ;;  %v1094_v62 = vcombine.high %v1093_v47, %v2858_v13 }
 0x457   : > { %v1118_v52 = vrot.slane %v1111_v48, %v993_v2 }
 0x458   : > { %v1129_v1 = vshrl.u32 %v1094_v62, 16 }
 0x459   : > { %v1122_v54 = vpack.i.b16 %v1118_v52, %v1093_v47  ;;  %v1124_v57 = vshrl.u32 %v1118_v52, 16  ;;  %v1119_v61 = vcombine.high %v1118_v52, %v2858_v13 }
 0x45b   : > { %2098 = vmatmul.mubr.msk.bf16.vlgmr.msra.gmra.mrb[0].mxu1 %vm1144_vm5, %v1122_v54  ;;  %v1125_v58 = vpack.i.b16 %v1124_v57, %v1123_v56  ;;  %v1130_v63 = vshrl.u32 %v1119_v61, 16  ;;  %v1128_v0 = vpack.i.b16 %v1119_v61, %v1094_v62 }
 0x45c   : > { %2108 = vmatpush3.bf16.xpose.msra.mxu1 %v1241_v55  ;;  %2109 = vmatprep.mubr.msk.bf16.mxu1 %vm2852_vm3, %v2851_v37 }
 0x45d   : > { %2104 = vmatmul.mubr.msk.bf16.vlgmr.msra.gmra.mrb[4].mxu0 %vm1144_vm5, %v1125_v58  ;;  %2119 = vmatprep.subr.bf16.mxu1 %v2851_v37  ;;  %v1131_v2 = vpack.i.b16 %v1130_v63, %v1129_v1 }
 0x45e   : > { %2114 = vmatpush3.bf16.xpose.msra.mxu0 %v1287_v59  ;;  %2115 = vmatprep.mubr.msk.bf16.mxu0 %vm2852_vm3, %v2851_v37 }
 0x45f   : > { %2125 = vmatprep.subr.bf16.mxu0 %v2851_v37 }
 0x463   : > { %2110 = vmatmul.mubr.msk.bf16.vlgmr.msra.gmra.mrb[4].mxu1 %vm1144_vm5, %v1128_v0 }
 0x464   : > { %2120 = vmatpush3.bf16.msra.mxu1 %v3363_v50  ;;  %2121 = vmatprep.mubr.msk.bf16.mxu1 %vm2852_vm3, %v2851_v37  ;;  %v1142_v50 = vrot.slane %v1137_v4, %v1141_v5 }
 0x465   : > { %2116 = vmatmul.mubr.msk.bf16.vlgmr.msra.gmra.mrb[8].mxu0 %vm1144_vm5, %v1131_v2  ;;  %2131 = vmatprep.subr.bf16.mxu1 %v2851_v37  ;;  %v1554_v2 = vld [vmem:[#allocation14] sm:$0xf] }
 0x466   : > { %2126 = vmatpush3.bf16.msra.mxu0 %v3365_v51  ;;  %2127 = vmatprep.mubr.msk.bf16.mxu0 %vm2852_vm3, %v2851_v37 }
 0x467   : > { %2137 = vmatprep.subr.bf16.mxu0 %v2851_v37 }
 0x52e   : > { %v1185_v6 = vpop.f32.mrb[0].mxu1 }
 0x52f   : > { %v1186_v7 = vadd.f32 %v1185_v6, %v1142_v50  ;;  %v2099_v8 = vpop.f32.mrb[1].mxu1  ;;  %v1563_v6 = vsel %vm1561_vm7, %v1554_v2, 0 }
 0x530   : > { %v1188_v9 = vpop.f32.mrb[2].mxu1  ;;  %v1231_v10 = vpop.f32.mrb[4].mxu0 }
 0x531   : > { %v1232_v11 = vadd.f32 %v1231_v10, %v1142_v50  ;;  %v2100_v12 = vpop.f32.mrb[3].mxu1  ;;  %v2105_v51 = vpop.f32.mrb[5].mxu0  ;;  %v1330_v13 = vsel %vm1329_vm6, %v1186_v7, -inf  ;;  %v1557_v10 = vld [vmem:[#allocation14 + $0xc] sm:$0xf] }
 0x532   : > { %1331 = vmax.xlane.f32.xlu1 %v1330_v13  ;;  %v1234_v14 = vpop.f32.mrb[6].mxu0 }
 0x533   : > { %v2106_v15 = vpop.f32.mrb[7].mxu0  ;;  %v1333_v16 = vsel %vm1329_vm6, %v1232_v11, -inf }
 0x534   : > { %1334 = vmax.xlane.f32.xlu0 %v1333_v16 }
 0x536   : > { %v1277_v17 = vpop.f32.mrb[4].mxu1 }
 0x537   : > { %v1278_v60 = vadd.f32 %v1277_v17, %v1142_v50  ;;  %v2111_v18 = vpop.f32.mrb[5].mxu1 }
 0x538   : > { %v1280_v19 = vpop.f32.mrb[6].mxu1  ;;  %v1323_v20 = vpop.f32.mrb[8].mxu0 }
 0x539   : > { %v1324_v21 = vadd.f32 %v1323_v20, %v1142_v50  ;;  %v2112_v22 = vpop.f32.mrb[7].mxu1  ;;  %v2117_v23 = vpop.f32.mrb[9].mxu0  ;;  %v1336_v24 = vsel %vm1329_vm6, %v1278_v60, -inf }
 0x53a   : > { %1337 = vmax.xlane.f32.xlu0 %v1336_v24  ;;  %v1326_v25 = vpop.f32.mrb[10].mxu0 }
 0x53b   : > { %v2118_v26 = vpop.f32.mrb[11].mxu0  ;;  %v1339_v27 = vsel %vm1329_vm6, %v1324_v21, -inf }
 0x53c   : > { %1340 = vmax.xlane.f32.xlu1 %v1339_v27 }
 0x5bf   : > { %v1332_v29 = vpop.xlane.xlu1 %1331 }
 0x5c0   : > { %v1342_v30 = vsub.f32 %v1186_v7, %v1332_v29 }
 0x5c1   : > { %v1335_v31 = vpop.xlane.xlu0 %1334 }
 0x5c2   : > { %v1346_v32 = vmul.f32 1.442695, %v1342_v30  ;;  %v1343_v33 = vsub.f32 %v1232_v11, %v1335_v31 }
 0x5c4   : > { %2379 = vpow2.f32 %v1346_v32  ;;  %v1348_v34 = vmul.f32 1.442695, %v1343_v33 }
 0x5c6   : > { %2381 = vpow2.f32 %v1348_v34 }
 0x5c7   : > { %v1338_v35 = vpop.xlane.xlu0 %1337 }
 0x5c8   : > { %v1344_v36 = vsub.f32 %v1278_v60, %v1338_v35  ;;  %v1701_v60 = vsel %vm1561_vm7, %v1557_v10, 0 }
 0x5c9   : > { %v1341_v38 = vpop.xlane.xlu1 %1340 }
 0x5ca   : > { %v1350_v28 = vmul.f32 1.442695, %v1344_v36  ;;  %v1345_v39 = vsub.f32 %v1324_v21, %v1341_v38 }
 0x5cc   : > { %2383 = vpow2.f32 %v1350_v28  ;;  %v1352_v41 = vmul.f32 1.442695, %v1345_v39 }
 0x5ce   : > { %v2380_v42 = vpop.eup %2379  ;;  %2385 = vpow2.f32 %v1352_v41 }
 0x5cf   : > { %v1354_v43 = vsel %vm1329_vm6, %v2380_v42, 0.0 }
 0x5d0   : > { %v2382_v44 = vpop.eup %2381  ;;  %1355 = vadd.xlane.f32.xlu0 %v1354_v43 }
 0x5d1   : > { %v1357_v45 = vsel %vm1329_vm6, %v2382_v44, 0.0 }
 0x5d2   : > { %1358 = vadd.xlane.f32.xlu1 %v1357_v45 }
 0x5d6   : > { %v2384_v46 = vpop.eup %2383 }
 0x5d7   : > { %v1360_v47 = vsel %vm1329_vm6, %v2384_v46, 0.0 }
 0x5d8   : > { %v2386_v48 = vpop.eup %2385  ;;  %1361 = vadd.xlane.f32.xlu0 %v1360_v47 }
 0x5d9   : > { %v1363_v52 = vsel %vm1329_vm6, %v2386_v48, 0.0 }
 0x5da   : > { %1364 = vadd.xlane.f32.xlu1 %v1363_v52  ;;  %v2040_v52 = vld [vmem:[#allocation15] ss:$0 sm:$0xff] }
 0x65d   : > { %v1356_v54 = vpop.xlane.xlu0 %1355 }
 0x65e   : > { %2387 = vrcp.f32 %v1356_v54 }
 0x65f   : > { %v1359_v55 = vpop.xlane.xlu1 %1358 }
 0x660   : > { %2389 = vrcp.f32 %v1359_v55 }
 0x665   : > { %v1362_v56 = vpop.xlane.xlu0 %1361 }
 0x666   : > { %2391 = vrcp.f32 %v1362_v56 }
 0x667   : > { %v1365_v57 = vpop.xlane.xlu1 %1364 }
 0x668   : > { %v2388_v58 = vpop.eup %2387  ;;  %2393 = vrcp.f32 %v1365_v57 }
 0x669   : > { %v1370_v59 = vmul.f32 %v2388_v58, %v2380_v42 }
 0x66a   : > { %v2390_v61 = vpop.eup %2389 }
 0x66b   : > { %v1371_v62 = vmul.f32 %v2390_v61, %v2382_v44  ;;  %v1374_v63 = vpack.c.bf16 %v1370_v59, %v1370_v59 }
 0x66d   : > { %2122 = vmatmul.mubr.msk.bf16.vlgmr.msra.gmra.mrb[8].mxu1 %vm1329_vm6, %v1374_v63  ;;  %v1375_v0 = vpack.c.bf16 %v1371_v62, %v1371_v62 }
 0x66e   : > { %2132 = vmatpush3.bf16.msra.mxu1 %v3377_v49  ;;  %2133 = vmatprep.mubr.msk.bf16.mxu1 %vm2852_vm3, %v2851_v37  ;;  %v1555_v49 = vld [vmem:[#allocation14 + $0x4] sm:$0xf] }
 0x66f   : > { %2128 = vmatmul.mubr.msk.bf16.vlgmr.msra.gmra.mrb[12].mxu0 %vm1329_vm6, %v1375_v0  ;;  %2143 = vmatprep.subr.bf16.mxu1 %v2851_v37  ;;  %v1609_v8 = vsel %vm1561_vm7, %v1555_v49, 0 }
 0x670   : > { %v2392_v1 = vpop.eup %2391  ;;  %2138 = vmatpush3.bf16.msra.mxu0 %v3379_v53  ;;  %2139 = vmatprep.mubr.msk.bf16.mxu0 %vm2852_vm3, %v2851_v37  ;;  %v1556_v53 = vld [vmem:[#allocation14 + $0x8] sm:$0xf] }
 0x671   : > { %v1372_v3 = vmul.f32 %v2392_v1, %v2384_v46  ;;  %2149 = vmatprep.subr.bf16.mxu0 %v2851_v37  ;;  %v1655_v51 = vsel %vm1561_vm7, %v1556_v53, 0 }
 0x672   : > { %v2394_v4 = vpop.eup %2393 }
 0x673   : > { %v1373_v5 = vmul.f32 %v2394_v4, %v2386_v48  ;;  %v1376_v50 = vpack.c.bf16 %v1372_v3, %v1372_v3 }
 0x675   : > { %2134 = vmatmul.mubr.msk.bf16.vlgmr.msra.gmra.mrb[12].mxu1 %vm1329_vm6, %v1376_v50  ;;  %v1377_v7 = vpack.c.bf16 %v1373_v5, %v1373_v5  ;;  %v2041_v50 = vld [vmem:[#allocation17] ss:$0 sm:$0xff] }
 0x676   : > { %2144 = vmatpush3.bf16.msra.mxu1 %v1563_v6  ;;  %2145 = vmatprep.mubr.msk.bf16.mxu1 %vm2852_vm3, %v2851_v37 }
 0x677   : > { %2140 = vmatmul.mubr.msk.bf16.vlgmr.msra.gmra.mrb[16].mxu0 %vm1329_vm6, %v1377_v7  ;;  %2155 = vmatprep.subr.bf16.mxu1 %v2851_v37  ;;  %v2042_v7 = vld [vmem:[#allocation18] ss:$0 sm:$0xff] }
 0x678   : > { %2150 = vmatpush3.bf16.msra.mxu0 %v1609_v8  ;;  %2151 = vmatprep.mubr.msk.bf16.mxu0 %vm2852_vm3, %v2851_v37 }
 0x679   : > { %2161 = vmatprep.subr.bf16.mxu0 %v2851_v37 }
 0x740   : > { %v1415_v9 = vpop.f32.mrb[8].mxu1 }
 0x741   : > { %v1550_v11 = vpack.c.bf16 %v1415_v9, %v1415_v9  ;;  %v2123_v12 = vpop.f32.mrb[9].mxu1 }
 0x742   : > { %v1418_v13 = vpop.f32.mrb[10].mxu1  ;;  %v1458_v14 = vpop.f32.mrb[12].mxu0 }
 0x743   : > { %v1551_v15 = vpack.c.bf16 %v1458_v14, %v1458_v14  ;;  %v2124_v16 = vpop.f32.mrb[11].mxu1  ;;  %v2129_v17 = vpop.f32.mrb[13].mxu0  ;;  %2146 = vmatmul.mubr.msk.bf16.vlgmr.msra.gmra.mrb[16].mxu1 %vm1144_vm5, %v1550_v11 }
 0x744   : > { %2156 = vmatpush3.bf16.msra.mxu1 %v1655_v51  ;;  %v1461_v18 = vpop.f32.mrb[14].mxu0  ;;  %2157 = vmatprep.mubr.msk.bf16.mxu1 %vm2852_vm3, %v2851_v37 }
 0x745   : > { %v2130_v19 = vpop.f32.mrb[15].mxu0  ;;  %2152 = vmatmul.mubr.msk.bf16.vlgmr.msra.gmra.mrb[20].mxu0 %vm1144_vm5, %v1551_v15 }
 0x746   : > { %2162 = vmatpush3.bf16.msra.mxu0 %v1701_v60  ;;  %2163 = vmatprep.mubr.msk.bf16.mxu0 %vm2852_vm3, %v2851_v37 }
 0x748   : > { %v1501_v20 = vpop.f32.mrb[12].mxu1 }
 0x749   : > { %v1552_v21 = vpack.c.bf16 %v1501_v20, %v1501_v20  ;;  %v2135_v22 = vpop.f32.mrb[13].mxu1 }
 0x74a   : > { %v1504_v23 = vpop.f32.mrb[14].mxu1  ;;  %v1544_v24 = vpop.f32.mrb[16].mxu0 }
 0x74b   : > { %v1553_v25 = vpack.c.bf16 %v1544_v24, %v1544_v24  ;;  %v2136_v26 = vpop.f32.mrb[15].mxu1  ;;  %v2141_v27 = vpop.f32.mrb[17].mxu0  ;;  %2158 = vmatmul.mubr.msk.bf16.vlgmr.msra.gmra.mrb[20].mxu1 %vm1144_vm5, %v1552_v21 }
 0x74c   : > { %v1547_v29 = vpop.f32.mrb[18].mxu0 }
 0x74d   : > { %v2142_v30 = vpop.f32.mrb[19].mxu0  ;;  %2164 = vmatmul.mubr.msk.bf16.vlgmr.msra.gmra.mrb[24].mxu0 %vm1144_vm5, %v1553_v25 }
 0x816   : > { %v1599_v31 = vpop.f32.mrb[16].mxu1 }
 0x817   : > { %v2147_v32 = vpop.f32.mrb[17].mxu1  ;;  %v1743_v37 = vsel %vm918_vm4, %v1599_v31, 0.0 }
 0x818   : > { %v1602_v33 = vpop.f32.mrb[18].mxu1  ;;  %v1645_v34 = vpop.f32.mrb[20].mxu0 }
 0x819   : > { %v1744_v35 = vsel %vm918_vm4, %v1645_v34, 0.0  ;;  %v2148_v36 = vpop.f32.mrb[19].mxu1  ;;  %v2153_v38 = vpop.f32.mrb[21].mxu0 }
 0x81a   : > { %v1745_v28 = vadd.f32 %v1744_v35, %v1743_v37  ;;  %v1648_v39 = vpop.f32.mrb[22].mxu0 }
 0x81b   : > { %v2154_v41 = vpop.f32.mrb[23].mxu0 }
 0x81e   : > { %v1691_v42 = vpop.f32.mrb[20].mxu1 }
 0x81f   : > { %v1746_v43 = vsel %vm918_vm4, %v1691_v42, 0.0  ;;  %v2159_v44 = vpop.f32.mrb[21].mxu1 }
 0x820   : > { %v1747_v45 = vadd.f32 %v1746_v43, %v1745_v28  ;;  %v1694_v46 = vpop.f32.mrb[22].mxu1  ;;  %v1737_v47 = vpop.f32.mrb[24].mxu0 }
 0x821   : > { %v1748_v48 = vsel %vm918_vm4, %v1737_v47, 0.0  ;;  %v2160_v54 = vpop.f32.mrb[23].mxu1  ;;  %v2165_v55 = vpop.f32.mrb[25].mxu0 }
 0x822   : > { %v1749_v56 = vadd.f32 %v1748_v48, %v1747_v45  ;;  %v1740_v57 = vpop.f32.mrb[26].mxu0 }
 0x823   : > { %v2166_v58 = vpop.f32.mrb[27].mxu0 }
 0x824   : > { %v1757_v59 = vadd.f32 %v2040_v52, %v1749_v56 }
 0x826   : > { %v1758_v61 = vadd.f32 %v1757_v59, %v3355_v40 }
 0x828   : > { %v1761_v62 = vsel %vm918_vm4, %v1758_v61, 0.0 }
 0x829   : > { %1762 = vadd.xlane.f32.xlu0 %v1761_v62 }
 0x8b6   : > { %v1763_v63 = vpop.xlane.xlu0 %1762 }
 0x8b7   : > { %v1765_v0 = vmul.f32 0.03125, %v1763_v63 }
 0x8b9   : > { %v1766_v1 = vsub.f32 %v1758_v61, %v1765_v0 }
 0x8bb   : > { %v1767_v2 = vmul.f32 %v1766_v1, %v1766_v1 }
 0x8bd   : > { %v1768_v3 = vsel %vm918_vm4, %v1767_v2, 0.0 }
 0x8be   : > { %1769 = vadd.xlane.f32.xlu1 %v1768_v3 }
 0x94b   : > { %v1770_v4 = vpop.xlane.xlu1 %1769 }
 0x94c   : > { %v1771_v49 = vmul.f32 0.03125, %v1770_v4 }
 0x94e   : > { %v1772_v5 = vadd.f32 1e-10, %v1771_v49 }
 0x950   : > { %2395 = vrsqrt.f32 %v1772_v5 }
 0x95a   : > { %v2396_v40 = vpop.eup %2395 }
 0x95b   : > { %v1774_v6 = vmul.f32 %v2396_v40, %v1766_v1 }
 0x95d   : > { %v1781_v8 = vmul.f32 %v2041_v50, %v1774_v6 }
 0x95f   : > { %v1788_v53 = vadd.f32 %v2042_v7, %v1781_v8 }
 0x961   : > { %1789 = vst.msk [vmem:[%s531_s5] sm:$0xff] %vm918_vm4, %v1788_v53 }
 0x962   : > { %2694 = shalt.err (!%p2691_p12)
}
 0x963   : > { %s2695_s26 = scalar_lea.hbm %s3458_s19, 128  ;;  %s2699_s16 = scalar_lea.hbm %s3605_s12, 512 }
 0x964   : > { %p2696_p6 = scmp.ne.s32.totalorder %s3458_s19, %s2695_s26  ;;  %p2700_p9 = scmp.lt.u32.totalorder %s3458_s19, %s3605_s12 }
 0x965   : > { %p2701_p3 = scmp.lt.u32.totalorder %s2699_s16, %s2695_s26  ;;  %p2703_p7 = scmp.lt.u32.totalorder %s2695_s26, %s3458_s19 }
 0x966   : > { %p2697_p0 = pnand %p2696_p6, %p3606_p1 }
 0x967   : > { %p2702_p10 = por %p2701_p3, %p2700_p9 }
 0x968   : > { %p2698_p8 = pneg %p2697_p0 }
 0x969   : > { %p2704_p13 = por %p2703_p7, %p2702_p10 }
 0x96b   : > { %p2705_p11 = pnand %p2704_p13, %p2698_p8 }
 0x96d   : > { %2708 = shalt.err (!%p2705_p11)
}
 0x96e   : > { %2203 = dma.vmem_to_hbm [thread:$0]  (%p3606_p1), %s3460_s24, 128, %s3458_s19, %s1791_s3  }
 0x96f PF: > { %s3607_s11 = sld [smem:[#allocation29_spill]]  ;;  %p2258_p4 = scmp.ge.s32.totalorder %s2827_s23, 2 }
 0x970   : > { %p3608_p5 = scmp.ne.s32.totalorder %s3583_s14, 0 }
 0x972   : > { %p2238_p2 = pnand %p2258_p4, %p3608_p5 }
 0x975   : > { %s1818_s0 = sand.u32 1, %s3607_s11  }
 0x976   : > { %s1819_s8 = scalar_lea.sflag [#allocation5], %s1818_s0 }
 0x977   : > { %2782 = dma.done.wait (!%p2238_p2), %s1819_s8, 128  }
 0x978   : > { %2784 = vsyncadd (!%p2238_p2), %s1819_s8, 4294967168  ;;  %s33_s23 = sadd.s32 1, %s2827_s23   ;;  %s3609_s13 = sld [smem:[#allocation30_spill]] }
 0x979   : > { %p30_p12 = scmp.ge.s32.totalorder %s33_s23, 6   ;;  %s3610_s14 = sld [smem:[#allocation31_spill]] }
 0x97a   : > { %s3611_s15 = smov %s3626_s1  ;;  %s3612_s16 = smov %s2803_s17 }
 0x97b   : > { %s3613_s17 = smov %s2807_s18  ;;  %s3614_s18 = smov %s3202_s10 }
 0x97c   : > { %s3615_s19 = smov %s2819_s21  ;;  %s3616_s20 = smov %s2823_s22 }
 0x97d   : > { %s3617_s21 = smov %s3620_s28  ;;  %s3618_s22 = smov %s3624_s29 }
 0x97e   :  { %32 = sbr.rel (!%p30_p12) target bundleno = 26 (0x1a), region = 155 }
 0x985   :  { %1824 = vsyncpa [#allocation4], 1 }
 0x986   :  { %1826 = vsyncpa [#allocation4 + $0x1], 1 }
 0x987   :  { %1827 = vsyncpa [#allocation7], 1 }
 0x988   :  { %1829 = vsyncpa [#allocation7 + $0x1], 1 }
 0x989   :  { %1830 = vsyncpa [#allocation10], 1 }
 0x98a   :  { %1831 = vsyncpa [#allocation13], 1 }
 0x98b   :  { %1832 = vsyncpa [#allocation16], 1 }
 0x98c   :  { %1833 = vsyncpa [#allocation19], 1 }
 0x98d   :  { %1834 = vsyncpa [#allocation5], 1 }
 0x98e   :  { %1836 = vsyncpa [#allocation5 + $0x1], 1 }

</bundles_post_ra>
